<compile_context>
chip_gen: v6e
topology: v6e:2x2x1
jax: 0.10.0
libtpu: 0.0.40
codegen_flags: <defaults>
</compile_context>

<pallas_src>
import functools

import jax
import jax.numpy as jnp
from jax.experimental import pallas as pl
from jax.experimental.pallas import tpu as pltpu


# ------------------------------------------------------------------ kernel ---

def _fused_kernel(w_ref, b_ref, x_ref, a_ref, bt_ref, o_ref, *, c_out, c_in):
    # w_ref : SMEM [c_out, c_in]   (1x1-conv weights, scalar reads)
    # b_ref : SMEM [c_out]         (bias, scalar reads)
    # x_ref : VMEM [1, c_in, H_in, W_in]   (one image, NCHW)
    # a_ref : VMEM [H_out, H_in]   (row interpolation matrix)
    # bt_ref: VMEM [W_in, W_out]   (column interpolation matrix, pre-transposed)
    # o_ref : VMEM [1, c_out, H_out, W_out]
    a = a_ref[...]
    bt = bt_ref[...]
    for co in range(c_out):
        # VPU channel mix: plane = sum_ci w[co,ci] * x[ci] + b[co]   (W on the lane axis)
        plane = x_ref[0, 0] * w_ref[co, 0] + b_ref[co]
        for ci in range(1, c_in):
            plane = plane + x_ref[0, ci] * w_ref[co, ci]
        # Bilinear upsample as two MXU matmuls, f32 accumulation.
        tmp = jnp.dot(a, plane, preferred_element_type=jnp.float32)       # [H_out, W_in]
        o_ref[0, co] = jnp.dot(tmp, bt, preferred_element_type=jnp.float32)  # [H_out, W_out]


# ---------------------------------------------------------------- wrappers ---

def _interp_matrix(out_size, in_size):
    """Bilinear interpolation matrix matching F.interpolate(align_corners=False)."""
    dst = jnp.arange(out_size, dtype=jnp.float32)
    src = (dst + 0.5) * (float(in_size) / float(out_size)) - 0.5
    src = jnp.clip(src, 0.0, float(in_size - 1))
    i0 = jnp.floor(src).astype(jnp.int32)
    i1 = jnp.minimum(i0 + 1, in_size - 1)
    w1 = src - i0.astype(jnp.float32)
    w0 = 1.0 - w1
    m = jnp.zeros((out_size, in_size), jnp.float32)
    m = m.at[jnp.arange(out_size), i0].add(w0)
    m = m.at[jnp.arange(out_size), i1].add(w1)
    return m


@functools.partial(jax.jit, static_argnames=("out_h", "out_w"))
def _seg_detector_pallas(x, weight, bias, *, out_h, out_w):
    n, c_in, h_in, w_in = x.shape
    c_out = weight.shape[0]

    a = _interp_matrix(out_h, h_in)                        # [H_out, H_in]
    bt = _interp_matrix(out_w, w_in).T                     # [W_in, W_out]  (pre-transposed)
    w_mat = weight.reshape(c_out, c_in).astype(jnp.float32)
    b_vec = bias.astype(jnp.float32)

    kernel = functools.partial(_fused_kernel, c_out=c_out, c_in=c_in)

    return pl.pallas_call(
        kernel,
        out_shape=jax.ShapeDtypeStruct((n, c_out, out_h, out_w), jnp.float32),
        grid=(n,),
        in_specs=[
            pl.BlockSpec(memory_space=pltpu.MemorySpace.SMEM),              # weights
            pl.BlockSpec(memory_space=pltpu.MemorySpace.SMEM),              # bias
            pl.BlockSpec((1, c_in, h_in, w_in), lambda i: (i, 0, 0, 0)),    # x, one image/step
            pl.BlockSpec((out_h, h_in), lambda i: (0, 0)),                  # A
            pl.BlockSpec((w_in, out_w), lambda i: (0, 0)),                  # B^T
        ],
        out_specs=pl.BlockSpec((1, c_out, out_h, out_w), lambda i: (i, 0, 0, 0)),
        compiler_params=pltpu.CompilerParams(
            dimension_semantics=("parallel",)),
    )(w_mat, b_vec, x.astype(jnp.float32), a, bt)


def seg_detector_forward(x, img, weight, bias):
    """Eval-mode SegDetector.forward: binarize (1x1 conv) + bilinear upsample to img size."""
    out_h, out_w = int(img.shape[2]), int(img.shape[3])
    return _seg_detector_pallas(x, weight, bias, out_h=out_h, out_w=out_w)
    # TODO(synk): training-mode dict split (pre_text=x[:,0], pre_kernel=x[:,1:]) is pure slicing
    # glue on the returned tensor; only the eval-mode tensor output is produced here.


# -------------------------------------------------------------------- main ---

if __name__ == "__main__":
    key = jax.random.PRNGKey(0)
    k_x, k_img, k_w, k_b = jax.random.split(key, 4)

    # small shapes consistent with the module: inner_channels=8, classes=7
    inner_channels, classes = 8, 7
    n, h, w = 2, 16, 16
    img_h, img_w = 64, 64                       # PSE feature map is typically 1/4 of the image

    x = jax.random.normal(k_x, (n, inner_channels, h, w), jnp.float32)
    img = jax.random.normal(k_img, (n, 3, img_h, img_w), jnp.float32)

    # deterministic 1x1-conv parameters (Conv2d(inner_channels, classes, 1))
    weight = jax.random.normal(k_w, (classes, inner_channels, 1, 1), jnp.float32) * 0.1
    bias = jax.random.normal(k_b, (classes,), jnp.float32) * 0.1

    out = seg_detector_forward(x, img, weight, bias)
    out = jax.block_until_ready(out)
    assert out.shape == (n, classes, img_h, img_w), out.shape

    # sanity check against a pure-JAX reference (same interpolation matrices)
    w2d = weight.reshape(classes, inner_channels)
    y_ref = jnp.einsum("nchw,oc->nohw", x, w2d) + bias[None, :, None, None]
    a_ref = _interp_matrix(img_h, h)
    b_ref = _interp_matrix(img_w, w)
    ref = jnp.einsum("Hh,nchw,Ww->ncHW", a_ref, y_ref, b_ref)
    assert jnp.allclose(out, ref, atol=1e-4, rtol=1e-4)

    print("KERNEL_OK")
</pallas_src>

<mosaic_0001>
module attributes {stable_mosaic.version = 11 : i64} {
  func.func private @main(%arg0: i32) attributes {dimension_semantics = [#tpu.dimension_semantics<core_parallel>], iteration_bounds = array<i64: 2>, tpu.core_type = #tpu.core_type<sc_scalar_subcore>, window_params = []} {
    return
  }
}

module attributes {stable_mosaic.version = 11 : i64} {
  func.func private @main(%arg0: i32) attributes {dimension_semantics = [#tpu.dimension_semantics<core_parallel>], iteration_bounds = array<i64: 2>, tpu.core_type = #tpu.core_type<sc_scalar_subcore>, window_params = []} {
    return
  }
}

module attributes {stable_mosaic.version = 11 : i64} {
  func.func @_fused_kernel(%arg0: i32, %arg1: memref<7x8xf32, #tpu.memory_space<smem>>, %arg2: memref<7xf32, #tpu.memory_space<smem>>, %arg3: memref<1x8x16x16xf32, #tpu.memory_space<vmem>>, %arg4: memref<64x16xf32, #tpu.memory_space<vmem>>, %arg5: memref<16x64xf32, #tpu.memory_space<vmem>>, %arg6: memref<1x7x64x64xf32, #tpu.memory_space<vmem>>) attributes {dimension_semantics = [#tpu.dimension_semantics<parallel>], iteration_bounds = array<i64: 2>, scalar_prefetch = 0 : i64, scratch_operands = 0 : i64, tpu.core_type = #tpu.core_type<tc>, window_params = [{transform_indices = @transform_0, window_bounds = array<i64: 7, 8>}, {transform_indices = @transform_1, window_bounds = array<i64: 7>}, {transform_indices = @transform_2, window_bounds = array<i64: 1, 8, 16, 16>}, {pipeline_mode = #tpu.pipeline_mode<synchronous>, transform_indices = @transform_3, window_bounds = array<i64: 64, 16>}, {pipeline_mode = #tpu.pipeline_mode<synchronous>, transform_indices = @transform_4, window_bounds = array<i64: 16, 64>}, {transform_indices = @transform_5, window_bounds = array<i64: 1, 7, 64, 64>}]} {
    %c0 = arith.constant 0 : index
    %c0_0 = arith.constant 0 : index
    %0 = vector.load %arg4[%c0, %c0_0] : memref<64x16xf32, #tpu.memory_space<vmem>>, vector<64x16xf32>
    %c0_1 = arith.constant 0 : index
    %c0_2 = arith.constant 0 : index
    %1 = vector.load %arg5[%c0_1, %c0_2] : memref<16x64xf32, #tpu.memory_space<vmem>>, vector<16x64xf32>
    %c0_3 = arith.constant 0 : index
    %c0_4 = arith.constant 0 : index
    %c0_5 = arith.constant 0 : index
    %c0_6 = arith.constant 0 : index
    %2 = vector.load %arg3[%c0_3, %c0_4, %c0_5, %c0_6] : memref<1x8x16x16xf32, #tpu.memory_space<vmem>>, vector<1x1x16x16xf32>
    %3 = vector.shape_cast %2 : vector<1x1x16x16xf32> to vector<16x16xf32>
    %c0_7 = arith.constant 0 : index
    %c0_8 = arith.constant 0 : index
    %4 = memref.load %arg1[%c0_7, %c0_8] : memref<7x8xf32, #tpu.memory_space<smem>>
    %5 = vector.broadcast %4 : f32 to vector<16x16xf32>
    %6 = arith.mulf %3, %5 : vector<16x16xf32>
    %c0_9 = arith.constant 0 : index
    %7 = memref.load %arg2[%c0_9] : memref<7xf32, #tpu.memory_space<smem>>
    %8 = vector.broadcast %7 : f32 to vector<16x16xf32>
    %9 = arith.addf %6, %8 : vector<16x16xf32>
    %c0_10 = arith.constant 0 : index
    %c1 = arith.constant 1 : index
    %c0_11 = arith.constant 0 : index
    %c0_12 = arith.constant 0 : index
    %10 = vector.load %arg3[%c0_10, %c1, %c0_11, %c0_12] : memref<1x8x16x16xf32, #tpu.memory_space<vmem>>, vector<1x1x16x16xf32>
    %11 = vector.shape_cast %10 : vector<1x1x16x16xf32> to vector<16x16xf32>
    %c0_13 = arith.constant 0 : index
    %c1_14 = arith.constant 1 : index
    %12 = memref.load %arg1[%c0_13, %c1_14] : memref<7x8xf32, #tpu.memory_space<smem>>
    %13 = vector.broadcast %12 : f32 to vector<16x16xf32>
    %14 = arith.mulf %11, %13 : vector<16x16xf32>
    %15 = arith.addf %9, %14 : vector<16x16xf32>
    %c0_15 = arith.constant 0 : index
    %c2 = arith.constant 2 : index
    %c0_16 = arith.constant 0 : index
    %c0_17 = arith.constant 0 : index
    %16 = vector.load %arg3[%c0_15, %c2, %c0_16, %c0_17] : memref<1x8x16x16xf32, #tpu.memory_space<vmem>>, vector<1x1x16x16xf32>
    %17 = vector.shape_cast %16 : vector<1x1x16x16xf32> to vector<16x16xf32>
    %c0_18 = arith.constant 0 : index
    %c2_19 = arith.constant 2 : index
    %18 = memref.load %arg1[%c0_18, %c2_19] : memref<7x8xf32, #tpu.memory_space<smem>>
    %19 = vector.broadcast %18 : f32 to vector<16x16xf32>
    %20 = arith.mulf %17, %19 : vector<16x16xf32>
    %21 = arith.addf %15, %20 : vector<16x16xf32>
    %c0_20 = arith.constant 0 : index
    %c3 = arith.constant 3 : index
    %c0_21 = arith.constant 0 : index
    %c0_22 = arith.constant 0 : index
    %22 = vector.load %arg3[%c0_20, %c3, %c0_21, %c0_22] : memref<1x8x16x16xf32, #tpu.memory_space<vmem>>, vector<1x1x16x16xf32>
    %23 = vector.shape_cast %22 : vector<1x1x16x16xf32> to vector<16x16xf32>
    %c0_23 = arith.constant 0 : index
    %c3_24 = arith.constant 3 : index
    %24 = memref.load %arg1[%c0_23, %c3_24] : memref<7x8xf32, #tpu.memory_space<smem>>
    %25 = vector.broadcast %24 : f32 to vector<16x16xf32>
    %26 = arith.mulf %23, %25 : vector<16x16xf32>
    %27 = arith.addf %21, %26 : vector<16x16xf32>
    %c0_25 = arith.constant 0 : index
    %c4 = arith.constant 4 : index
    %c0_26 = arith.constant 0 : index
    %c0_27 = arith.constant 0 : index
    %28 = vector.load %arg3[%c0_25, %c4, %c0_26, %c0_27] : memref<1x8x16x16xf32, #tpu.memory_space<vmem>>, vector<1x1x16x16xf32>
    %29 = vector.shape_cast %28 : vector<1x1x16x16xf32> to vector<16x16xf32>
    %c0_28 = arith.constant 0 : index
    %c4_29 = arith.constant 4 : index
    %30 = memref.load %arg1[%c0_28, %c4_29] : memref<7x8xf32, #tpu.memory_space<smem>>
    %31 = vector.broadcast %30 : f32 to vector<16x16xf32>
    %32 = arith.mulf %29, %31 : vector<16x16xf32>
    %33 = arith.addf %27, %32 : vector<16x16xf32>
    %c0_30 = arith.constant 0 : index
    %c5 = arith.constant 5 : index
    %c0_31 = arith.constant 0 : index
    %c0_32 = arith.constant 0 : index
    %34 = vector.load %arg3[%c0_30, %c5, %c0_31, %c0_32] : memref<1x8x16x16xf32, #tpu.memory_space<vmem>>, vector<1x1x16x16xf32>
    %35 = vector.shape_cast %34 : vector<1x1x16x16xf32> to vector<16x16xf32>
    %c0_33 = arith.constant 0 : index
    %c5_34 = arith.constant 5 : index
    %36 = memref.load %arg1[%c0_33, %c5_34] : memref<7x8xf32, #tpu.memory_space<smem>>
    %37 = vector.broadcast %36 : f32 to vector<16x16xf32>
    %38 = arith.mulf %35, %37 : vector<16x16xf32>
    %39 = arith.addf %33, %38 : vector<16x16xf32>
    %c0_35 = arith.constant 0 : index
    %c6 = arith.constant 6 : index
    %c0_36 = arith.constant 0 : index
    %c0_37 = arith.constant 0 : index
    %40 = vector.load %arg3[%c0_35, %c6, %c0_36, %c0_37] : memref<1x8x16x16xf32, #tpu.memory_space<vmem>>, vector<1x1x16x16xf32>
    %41 = vector.shape_cast %40 : vector<1x1x16x16xf32> to vector<16x16xf32>
    %c0_38 = arith.constant 0 : index
    %c6_39 = arith.constant 6 : index
    %42 = memref.load %arg1[%c0_38, %c6_39] : memref<7x8xf32, #tpu.memory_space<smem>>
    %43 = vector.broadcast %42 : f32 to vector<16x16xf32>
    %44 = arith.mulf %41, %43 : vector<16x16xf32>
    %45 = arith.addf %39, %44 : vector<16x16xf32>
    %c0_40 = arith.constant 0 : index
    %c7 = arith.constant 7 : index
    %c0_41 = arith.constant 0 : index
    %c0_42 = arith.constant 0 : index
    %46 = vector.load %arg3[%c0_40, %c7, %c0_41, %c0_42] : memref<1x8x16x16xf32, #tpu.memory_space<vmem>>, vector<1x1x16x16xf32>
    %47 = vector.shape_cast %46 : vector<1x1x16x16xf32> to vector<16x16xf32>
    %c0_43 = arith.constant 0 : index
    %c7_44 = arith.constant 7 : index
    %48 = memref.load %arg1[%c0_43, %c7_44] : memref<7x8xf32, #tpu.memory_space<smem>>
    %49 = vector.broadcast %48 : f32 to vector<16x16xf32>
    %50 = arith.mulf %47, %49 : vector<16x16xf32>
    %51 = arith.addf %45, %50 : vector<16x16xf32>
    %cst = arith.constant dense<0.000000e+00> : vector<64x16xf32>
    %52 = tpu.matmul %0, %51, %cst {dimension_numbers = #tpu.dot_dimension_numbers<[1], [0], [0], [1], [0, 0, 1, 1], [], []>} : vector<64x16xf32>, vector<16x16xf32>, vector<64x16xf32> -> vector<64x16xf32>
    %cst_45 = arith.constant dense<0.000000e+00> : vector<64x64xf32>
    %53 = tpu.matmul %52, %1, %cst_45 {dimension_numbers = #tpu.dot_dimension_numbers<[1], [0], [0], [1], [0, 0, 1, 1], [], []>} : vector<64x16xf32>, vector<16x64xf32>, vector<64x64xf32> -> vector<64x64xf32>
    %c0_46 = arith.constant 0 : index
    %c0_47 = arith.constant 0 : index
    %c0_48 = arith.constant 0 : index
    %c0_49 = arith.constant 0 : index
    %54 = vector.load %arg6[%c0_46, %c0_47, %c0_48, %c0_49] : memref<1x7x64x64xf32, #tpu.memory_space<vmem>>, vector<1x1x64x64xf32>
    %55 = vector.shape_cast %54 : vector<1x1x64x64xf32> to vector<64x64xf32>
    %56 = vector.shape_cast %53 : vector<64x64xf32> to vector<1x1x64x64xf32>
    tpu.vector_store %arg6[%c0_46, %c0_47, %c0_48, %c0_49], %56 {strides = array<i32>} : memref<1x7x64x64xf32, #tpu.memory_space<vmem>>, vector<1x1x64x64xf32>,
    %c0_50 = arith.constant 0 : index
    %c0_51 = arith.constant 0 : index
    %c0_52 = arith.constant 0 : index
    %c0_53 = arith.constant 0 : index
    %57 = vector.load %arg3[%c0_50, %c0_51, %c0_52, %c0_53] : memref<1x8x16x16xf32, #tpu.memory_space<vmem>>, vector<1x1x16x16xf32>
    %58 = vector.shape_cast %57 : vector<1x1x16x16xf32> to vector<16x16xf32>
    %c1_54 = arith.constant 1 : index
    %c0_55 = arith.constant 0 : index
    %59 = memref.load %arg1[%c1_54, %c0_55] : memref<7x8xf32, #tpu.memory_space<smem>>
    %60 = vector.broadcast %59 : f32 to vector<16x16xf32>
    %61 = arith.mulf %58, %60 : vector<16x16xf32>
    %c1_56 = arith.constant 1 : index
    %62 = memref.load %arg2[%c1_56] : memref<7xf32, #tpu.memory_space<smem>>
    %63 = vector.broadcast %62 : f32 to vector<16x16xf32>
    %64 = arith.addf %61, %63 : vector<16x16xf32>
    %c0_57 = arith.constant 0 : index
    %c1_58 = arith.constant 1 : index
    %c0_59 = arith.constant 0 : index
    %c0_60 = arith.constant 0 : index
    %65 = vector.load %arg3[%c0_57, %c1_58, %c0_59, %c0_60] : memref<1x8x16x16xf32, #tpu.memory_space<vmem>>, vector<1x1x16x16xf32>
    %66 = vector.shape_cast %65 : vector<1x1x16x16xf32> to vector<16x16xf32>
    %c1_61 = arith.constant 1 : index
    %c1_62 = arith.constant 1 : index
    %67 = memref.load %arg1[%c1_61, %c1_62] : memref<7x8xf32, #tpu.memory_space<smem>>
    %68 = vector.broadcast %67 : f32 to vector<16x16xf32>
    %69 = arith.mulf %66, %68 : vector<16x16xf32>
    %70 = arith.addf %64, %69 : vector<16x16xf32>
    %c0_63 = arith.constant 0 : index
    %c2_64 = arith.constant 2 : index
    %c0_65 = arith.constant 0 : index
    %c0_66 = arith.constant 0 : index
    %71 = vector.load %arg3[%c0_63, %c2_64, %c0_65, %c0_66] : memref<1x8x16x16xf32, #tpu.memory_space<vmem>>, vector<1x1x16x16xf32>
    %72 = vector.shape_cast %71 : vector<1x1x16x16xf32> to vector<16x16xf32>
    %c1_67 = arith.constant 1 : index
    %c2_68 = arith.constant 2 : index
    %73 = memref.load %arg1[%c1_67, %c2_68] : memref<7x8xf32, #tpu.memory_space<smem>>
    %74 = vector.broadcast %73 : f32 to vector<16x16xf32>
    %75 = arith.mulf %72, %74 : vector<16x16xf32>
    %76 = arith.addf %70, %75 : vector<16x16xf32>
    %c0_69 = arith.constant 0 : index
    %c3_70 = arith.constant 3 : index
    %c0_71 = arith.constant 0 : index
    %c0_72 = arith.constant 0 : index
    %77 = vector.load %arg3[%c0_69, %c3_70, %c0_71, %c0_72] : memref<1x8x16x16xf32, #tpu.memory_space<vmem>>, vector<1x1x16x16xf32>
    %78 = vector.shape_cast %77 : vector<1x1x16x16xf32> to vector<16x16xf32>
    %c1_73 = arith.constant 1 : index
    %c3_74 = arith.constant 3 : index
    %79 = memref.load %arg1[%c1_73, %c3_74] : memref<7x8xf32, #tpu.memory_space<smem>>
    %80 = vector.broadcast %79 : f32 to vector<16x16xf32>
    %81 = arith.mulf %78, %80 : vector<16x16xf32>
    %82 = arith.addf %76, %81 : vector<16x16xf32>
    %c0_75 = arith.constant 0 : index
    %c4_76 = arith.constant 4 : index
    %c0_77 = arith.constant 0 : index
    %c0_78 = arith.constant 0 : index
    %83 = vector.load %arg3[%c0_75, %c4_76, %c0_77, %c0_78] : memref<1x8x16x16xf32, #tpu.memory_space<vmem>>, vector<1x1x16x16xf32>
    %84 = vector.shape_cast %83 : vector<1x1x16x16xf32> to vector<16x16xf32>
    %c1_79 = arith.constant 1 : index
    %c4_80 = arith.constant 4 : index
    %85 = memref.load %arg1[%c1_79, %c4_80] : memref<7x8xf32, #tpu.memory_space<smem>>
    %86 = vector.broadcast %85 : f32 to vector<16x16xf32>
    %87 = arith.mulf %84, %86 : vector<16x16xf32>
    %88 = arith.addf %82, %87 : vector<16x16xf32>
    %c0_81 = arith.constant 0 : index
    %c5_82 = arith.constant 5 : index
    %c0_83 = arith.constant 0 : index
    %c0_84 = arith.constant 0 : index
    %89 = vector.load %arg3[%c0_81, %c5_82, %c0_83, %c0_84] : memref<1x8x16x16xf32, #tpu.memory_space<vmem>>, vector<1x1x16x16xf32>
    %90 = vector.shape_cast %89 : vector<1x1x16x16xf32> to vector<16x16xf32>
    %c1_85 = arith.constant 1 : index
    %c5_86 = arith.constant 5 : index
    %91 = memref.load %arg1[%c1_85, %c5_86] : memref<7x8xf32, #tpu.memory_space<smem>>
    %92 = vector.broadcast %91 : f32 to vector<16x16xf32>
    %93 = arith.mulf %90, %92 : vector<16x16xf32>
    %94 = arith.addf %88, %93 : vector<16x16xf32>
    %c0_87 = arith.constant 0 : index
    %c6_88 = arith.constant 6 : index
    %c0_89 = arith.constant 0 : index
    %c0_90 = arith.constant 0 : index
    %95 = vector.load %arg3[%c0_87, %c6_88, %c0_89, %c0_90] : memref<1x8x16x16xf32, #tpu.memory_space<vmem>>, vector<1x1x16x16xf32>
    %96 = vector.shape_cast %95 : vector<1x1x16x16xf32> to vector<16x16xf32>
    %c1_91 = arith.constant 1 : index
    %c6_92 = arith.constant 6 : index
    %97 = memref.load %arg1[%c1_91, %c6_92] : memref<7x8xf32, #tpu.memory_space<smem>>
    %98 = vector.broadcast %97 : f32 to vector<16x16xf32>
    %99 = arith.mulf %96, %98 : vector<16x16xf32>
    %100 = arith.addf %94, %99 : vector<16x16xf32>
    %c0_93 = arith.constant 0 : index
    %c7_94 = arith.constant 7 : index
    %c0_95 = arith.constant 0 : index
    %c0_96 = arith.constant 0 : index
    %101 = vector.load %arg3[%c0_93, %c7_94, %c0_95, %c0_96] : memref<1x8x16x16xf32, #tpu.memory_space<vmem>>, vector<1x1x16x16xf32>
    %102 = vector.shape_cast %101 : vector<1x1x16x16xf32> to vector<16x16xf32>
    %c1_97 = arith.constant 1 : index
    %c7_98 = arith.constant 7 : index
    %103 = memref.load %arg1[%c1_97, %c7_98] : memref<7x8xf32, #tpu.memory_space<smem>>
    %104 = vector.broadcast %103 : f32 to vector<16x16xf32>
    %105 = arith.mulf %102, %104 : vector<16x16xf32>
    %106 = arith.addf %100, %105 : vector<16x16xf32>
    %cst_99 = arith.constant dense<0.000000e+00> : vector<64x16xf32>
    %107 = tpu.matmul %0, %106, %cst_99 {dimension_numbers = #tpu.dot_dimension_numbers<[1], [0], [0], [1], [0, 0, 1, 1], [], []>} : vector<64x16xf32>, vector<16x16xf32>, vector<64x16xf32> -> vector<64x16xf32>
    %cst_100 = arith.constant dense<0.000000e+00> : vector<64x64xf32>
    %108 = tpu.matmul %107, %1, %cst_100 {dimension_numbers = #tpu.dot_dimension_numbers<[1], [0], [0], [1], [0, 0, 1, 1], [], []>} : vector<64x16xf32>, vector<16x64xf32>, vector<64x64xf32> -> vector<64x64xf32>
    %c0_101 = arith.constant 0 : index
    %c1_102 = arith.constant 1 : index
    %c0_103 = arith.constant 0 : index
    %c0_104 = arith.constant 0 : index
    %109 = vector.load %arg6[%c0_101, %c1_102, %c0_103, %c0_104] : memref<1x7x64x64xf32, #tpu.memory_space<vmem>>, vector<1x1x64x64xf32>
    %110 = vector.shape_cast %109 : vector<1x1x64x64xf32> to vector<64x64xf32>
    %111 = vector.shape_cast %108 : vector<64x64xf32> to vector<1x1x64x64xf32>
    tpu.vector_store %arg6[%c0_101, %c1_102, %c0_103, %c0_104], %111 {strides = array<i32>} : memref<1x7x64x64xf32, #tpu.memory_space<vmem>>, vector<1x1x64x64xf32>,
    %c0_105 = arith.constant 0 : index
    %c0_106 = arith.constant 0 : index
    %c0_107 = arith.constant 0 : index
    %c0_108 = arith.constant 0 : index
    %112 = vector.load %arg3[%c0_105, %c0_106, %c0_107, %c0_108] : memref<1x8x16x16xf32, #tpu.memory_space<vmem>>, vector<1x1x16x16xf32>
    %113 = vector.shape_cast %112 : vector<1x1x16x16xf32> to vector<16x16xf32>
    %c2_109 = arith.constant 2 : index
    %c0_110 = arith.constant 0 : index
    %114 = memref.load %arg1[%c2_109, %c0_110] : memref<7x8xf32, #tpu.memory_space<smem>>
    %115 = vector.broadcast %114 : f32 to vector<16x16xf32>
    %116 = arith.mulf %113, %115 : vector<16x16xf32>
    %c2_111 = arith.constant 2 : index
    %117 = memref.load %arg2[%c2_111] : memref<7xf32, #tpu.memory_space<smem>>
    %118 = vector.broadcast %117 : f32 to vector<16x16xf32>
    %119 = arith.addf %116, %118 : vector<16x16xf32>
    %c0_112 = arith.constant 0 : index
    %c1_113 = arith.constant 1 : index
    %c0_114 = arith.constant 0 : index
    %c0_115 = arith.constant 0 : index
    %120 = vector.load %arg3[%c0_112, %c1_113, %c0_114, %c0_115] : memref<1x8x16x16xf32, #tpu.memory_space<vmem>>, vector<1x1x16x16xf32>
    %121 = vector.shape_cast %120 : vector<1x1x16x16xf32> to vector<16x16xf32>
    %c2_116 = arith.constant 2 : index
    %c1_117 = arith.constant 1 : index
    %122 = memref.load %arg1[%c2_116, %c1_117] : memref<7x8xf32, #tpu.memory_space<smem>>
    %123 = vector.broadcast %122 : f32 to vector<16x16xf32>
    %124 = arith.mulf %121, %123 : vector<16x16xf32>
    %125 = arith.addf %119, %124 : vector<16x16xf32>
    %c0_118 = arith.constant 0 : index
    %c2_119 = arith.constant 2 : index
    %c0_120 = arith.constant 0 : index
    %c0_121 = arith.constant 0 : index
    %126 = vector.load %arg3[%c0_118, %c2_119, %c0_120, %c0_121] : memref<1x8x16x16xf32, #tpu.memory_space<vmem>>, vector<1x1x16x16xf32>
    %127 = vector.shape_cast %126 : vector<1x1x16x16xf32> to vector<16x16xf32>
    %c2_122 = arith.constant 2 : index
    %c2_123 = arith.constant 2 : index
    %128 = memref.load %arg1[%c2_122, %c2_123] : memref<7x8xf32, #tpu.memory_space<smem>>
    %129 = vector.broadcast %128 : f32 to vector<16x16xf32>
    %130 = arith.mulf %127, %129 : vector<16x16xf32>
    %131 = arith.addf %125, %130 : vector<16x16xf32>
    %c0_124 = arith.constant 0 : index
    %c3_125 = arith.constant 3 : index
    %c0_126 = arith.constant 0 : index
    %c0_127 = arith.constant 0 : index
    %132 = vector.load %arg3[%c0_124, %c3_125, %c0_126, %c0_127] : memref<1x8x16x16xf32, #tpu.memory_space<vmem>>, vector<1x1x16x16xf32>
    %133 = vector.shape_cast %132 : vector<1x1x16x16xf32> to vector<16x16xf32>
    %c2_128 = arith.constant 2 : index
    %c3_129 = arith.constant 3 : index
    %134 = memref.load %arg1[%c2_128, %c3_129] : memref<7x8xf32, #tpu.memory_space<smem>>
    %135 = vector.broadcast %134 : f32 to vector<16x16xf32>
    %136 = arith.mulf %133, %135 : vector<16x16xf32>
    %137 = arith.addf %131, %136 : vector<16x16xf32>
    %c0_130 = arith.constant 0 : index
    %c4_131 = arith.constant 4 : index
    %c0_132 = arith.constant 0 : index
    %c0_133 = arith.constant 0 : index
    %138 = vector.load %arg3[%c0_130, %c4_131, %c0_132, %c0_133] : memref<1x8x16x16xf32, #tpu.memory_space<vmem>>, vector<1x1x16x16xf32>
    %139 = vector.shape_cast %138 : vector<1x1x16x16xf32> to vector<16x16xf32>
    %c2_134 = arith.constant 2 : index
    %c4_135 = arith.constant 4 : index
    %140 = memref.load %arg1[%c2_134, %c4_135] : memref<7x8xf32, #tpu.memory_space<smem>>
    %141 = vector.broadcast %140 : f32 to vector<16x16xf32>
    %142 = arith.mulf %139, %141 : vector<16x16xf32>
    %143 = arith.addf %137, %142 : vector<16x16xf32>
    %c0_136 = arith.constant 0 : index
    %c5_137 = arith.constant 5 : index
    %c0_138 = arith.constant 0 : index
    %c0_139 = arith.constant 0 : index
    %144 = vector.load %arg3[%c0_136, %c5_137, %c0_138, %c0_139] : memref<1x8x16x16xf32, #tpu.memory_space<vmem>>, vector<1x1x16x16xf32>
    %145 = vector.shape_cast %144 : vector<1x1x16x16xf32> to vector<16x16xf32>
    %c2_140 = arith.constant 2 : index
    %c5_141 = arith.constant 5 : index
    %146 = memref.load %arg1[%c2_140, %c5_141] : memref<7x8xf32, #tpu.memory_space<smem>>
    %147 = vector.broadcast %146 : f32 to vector<16x16xf32>
    %148 = arith.mulf %145, %147 : vector<16x16xf32>
    %149 = arith.addf %143, %148 : vector<16x16xf32>
    %c0_142 = arith.constant 0 : index
    %c6_143 = arith.constant 6 : index
    %c0_144 = arith.constant 0 : index
    %c0_145 = arith.constant 0 : index
    %150 = vector.load %arg3[%c0_142, %c6_143, %c0_144, %c0_145] : memref<1x8x16x16xf32, #tpu.memory_space<vmem>>, vector<1x1x16x16xf32>
    %151 = vector.shape_cast %150 : vector<1x1x16x16xf32> to vector<16x16xf32>
    %c2_146 = arith.constant 2 : index
    %c6_147 = arith.constant 6 : index
    %152 = memref.load %arg1[%c2_146, %c6_147] : memref<7x8xf32, #tpu.memory_space<smem>>
    %153 = vector.broadcast %152 : f32 to vector<16x16xf32>
    %154 = arith.mulf %151, %153 : vector<16x16xf32>
    %155 = arith.addf %149, %154 : vector<16x16xf32>
    %c0_148 = arith.constant 0 : index
    %c7_149 = arith.constant 7 : index
    %c0_150 = arith.constant 0 : index
    %c0_151 = arith.constant 0 : index
    %156 = vector.load %arg3[%c0_148, %c7_149, %c0_150, %c0_151] : memref<1x8x16x16xf32, #tpu.memory_space<vmem>>, vector<1x1x16x16xf32>
    %157 = vector.shape_cast %156 : vector<1x1x16x16xf32> to vector<16x16xf32>
    %c2_152 = arith.constant 2 : index
    %c7_153 = arith.constant 7 : index
    %158 = memref.load %arg1[%c2_152, %c7_153] : memref<7x8xf32, #tpu.memory_space<smem>>
    %159 = vector.broadcast %158 : f32 to vector<16x16xf32>
    %160 = arith.mulf %157, %159 : vector<16x16xf32>
    %161 = arith.addf %155, %160 : vector<16x16xf32>
    %cst_154 = arith.constant dense<0.000000e+00> : vector<64x16xf32>
    %162 = tpu.matmul %0, %161, %cst_154 {dimension_numbers = #tpu.dot_dimension_numbers<[1], [0], [0], [1], [0, 0, 1, 1], [], []>} : vector<64x16xf32>, vector<16x16xf32>, vector<64x16xf32> -> vector<64x16xf32>
    %cst_155 = arith.constant dense<0.000000e+00> : vector<64x64xf32>
    %163 = tpu.matmul %162, %1, %cst_155 {dimension_numbers = #tpu.dot_dimension_numbers<[1], [0], [0], [1], [0, 0, 1, 1], [], []>} : vector<64x16xf32>, vector<16x64xf32>, vector<64x64xf32> -> vector<64x64xf32>
    %c0_156 = arith.constant 0 : index
    %c2_157 = arith.constant 2 : index
    %c0_158 = arith.constant 0 : index
    %c0_159 = arith.constant 0 : index
    %164 = vector.load %arg6[%c0_156, %c2_157, %c0_158, %c0_159] : memref<1x7x64x64xf32, #tpu.memory_space<vmem>>, vector<1x1x64x64xf32>
    %165 = vector.shape_cast %164 : vector<1x1x64x64xf32> to vector<64x64xf32>
    %166 = vector.shape_cast %163 : vector<64x64xf32> to vector<1x1x64x64xf32>
    tpu.vector_store %arg6[%c0_156, %c2_157, %c0_158, %c0_159], %166 {strides = array<i32>} : memref<1x7x64x64xf32, #tpu.memory_space<vmem>>, vector<1x1x64x64xf32>,
    %c0_160 = arith.constant 0 : index
    %c0_161 = arith.constant 0 : index
    %c0_162 = arith.constant 0 : index
    %c0_163 = arith.constant 0 : index
    %167 = vector.load %arg3[%c0_160, %c0_161, %c0_162, %c0_163] : memref<1x8x16x16xf32, #tpu.memory_space<vmem>>, vector<1x1x16x16xf32>
    %168 = vector.shape_cast %167 : vector<1x1x16x16xf32> to vector<16x16xf32>
    %c3_164 = arith.constant 3 : index
    %c0_165 = arith.constant 0 : index
    %169 = memref.load %arg1[%c3_164, %c0_165] : memref<7x8xf32, #tpu.memory_space<smem>>
    %170 = vector.broadcast %169 : f32 to vector<16x16xf32>
    %171 = arith.mulf %168, %170 : vector<16x16xf32>
    %c3_166 = arith.constant 3 : index
    %172 = memref.load %arg2[%c3_166] : memref<7xf32, #tpu.memory_space<smem>>
    %173 = vector.broadcast %172 : f32 to vector<16x16xf32>
    %174 = arith.addf %171, %173 : vector<16x16xf32>
    %c0_167 = arith.constant 0 : index
    %c1_168 = arith.constant 1 : index
    %c0_169 = arith.constant 0 : index
    %c0_170 = arith.constant 0 : index
    %175 = vector.load %arg3[%c0_167, %c1_168, %c0_169, %c0_170] : memref<1x8x16x16xf32, #tpu.memory_space<vmem>>, vector<1x1x16x16xf32>
    %176 = vector.shape_cast %175 : vector<1x1x16x16xf32> to vector<16x16xf32>
    %c3_171 = arith.constant 3 : index
    %c1_172 = arith.constant 1 : index
    %177 = memref.load %arg1[%c3_171, %c1_172] : memref<7x8xf32, #tpu.memory_space<smem>>
    %178 = vector.broadcast %177 : f32 to vector<16x16xf32>
    %179 = arith.mulf %176, %178 : vector<16x16xf32>
    %180 = arith.addf %174, %179 : vector<16x16xf32>
    %c0_173 = arith.constant 0 : index
    %c2_174 = arith.constant 2 : index
    %c0_175 = arith.constant 0 : index
    %c0_176 = arith.constant 0 : index
    %181 = vector.load %arg3[%c0_173, %c2_174, %c0_175, %c0_176] : memref<1x8x16x16xf32, #tpu.memory_space<vmem>>, vector<1x1x16x16xf32>
    %182 = vector.shape_cast %181 : vector<1x1x16x16xf32> to vector<16x16xf32>
    %c3_177 = arith.constant 3 : index
    %c2_178 = arith.constant 2 : index
    %183 = memref.load %arg1[%c3_177, %c2_178] : memref<7x8xf32, #tpu.memory_space<smem>>
    %184 = vector.broadcast %183 : f32 to vector<16x16xf32>
    %185 = arith.mulf %182, %184 : vector<16x16xf32>
    %186 = arith.addf %180, %185 : vector<16x16xf32>
    %c0_179 = arith.constant 0 : index
    %c3_180 = arith.constant 3 : index
    %c0_181 = arith.constant 0 : index
    %c0_182 = arith.constant 0 : index
    %187 = vector.load %arg3[%c0_179, %c3_180, %c0_181, %c0_182] : memref<1x8x16x16xf32, #tpu.memory_space<vmem>>, vector<1x1x16x16xf32>
    %188 = vector.shape_cast %187 : vector<1x1x16x16xf32> to vector<16x16xf32>
    %c3_183 = arith.constant 3 : index
    %c3_184 = arith.constant 3 : index
    %189 = memref.load %arg1[%c3_183, %c3_184] : memref<7x8xf32, #tpu.memory_space<smem>>
    %190 = vector.broadcast %189 : f32 to vector<16x16xf32>
    %191 = arith.mulf %188, %190 : vector<16x16xf32>
    %192 = arith.addf %186, %191 : vector<16x16xf32>
    %c0_185 = arith.constant 0 : index
    %c4_186 = arith.constant 4 : index
    %c0_187 = arith.constant 0 : index
    %c0_188 = arith.constant 0 : index
    %193 = vector.load %arg3[%c0_185, %c4_186, %c0_187, %c0_188] : memref<1x8x16x16xf32, #tpu.memory_space<vmem>>, vector<1x1x16x16xf32>
    %194 = vector.shape_cast %193 : vector<1x1x16x16xf32> to vector<16x16xf32>
    %c3_189 = arith.constant 3 : index
    %c4_190 = arith.constant 4 : index
    %195 = memref.load %arg1[%c3_189, %c4_190] : memref<7x8xf32, #tpu.memory_space<smem>>
    %196 = vector.broadcast %195 : f32 to vector<16x16xf32>
    %197 = arith.mulf %194, %196 : vector<16x16xf32>
    %198 = arith.addf %192, %197 : vector<16x16xf32>
    %c0_191 = arith.constant 0 : index
    %c5_192 = arith.constant 5 : index
    %c0_193 = arith.constant 0 : index
    %c0_194 = arith.constant 0 : index
    %199 = vector.load %arg3[%c0_191, %c5_192, %c0_193, %c0_194] : memref<1x8x16x16xf32, #tpu.memory_space<vmem>>, vector<1x1x16x16xf32>
    %200 = vector.shape_cast %199 : vector<1x1x16x16xf32> to vector<16x16xf32>
    %c3_195 = arith.constant 3 : index
    %c5_196 = arith.constant 5 : index
    %201 = memref.load %arg1[%c3_195, %c5_196] : memref<7x8xf32, #tpu.memory_space<smem>>
    %202 = vector.broadcast %201 : f32 to vector<16x16xf32>
    %203 = arith.mulf %200, %202 : vector<16x16xf32>
    %204 = arith.addf %198, %203 : vector<16x16xf32>
    %c0_197 = arith.constant 0 : index
    %c6_198 = arith.constant 6 : index
    %c0_199 = arith.constant 0 : index
    %c0_200 = arith.constant 0 : index
    %205 = vector.load %arg3[%c0_197, %c6_198, %c0_199, %c0_200] : memref<1x8x16x16xf32, #tpu.memory_space<vmem>>, vector<1x1x16x16xf32>
    %206 = vector.shape_cast %205 : vector<1x1x16x16xf32> to vector<16x16xf32>
    %c3_201 = arith.constant 3 : index
    %c6_202 = arith.constant 6 : index
    %207 = memref.load %arg1[%c3_201, %c6_202] : memref<7x8xf32, #tpu.memory_space<smem>>
    %208 = vector.broadcast %207 : f32 to vector<16x16xf32>
    %209 = arith.mulf %206, %208 : vector<16x16xf32>
    %210 = arith.addf %204, %209 : vector<16x16xf32>
    %c0_203 = arith.constant 0 : index
    %c7_204 = arith.constant 7 : index
    %c0_205 = arith.constant 0 : index
    %c0_206 = arith.constant 0 : index
    %211 = vector.load %arg3[%c0_203, %c7_204, %c0_205, %c0_206] : memref<1x8x16x16xf32, #tpu.memory_space<vmem>>, vector<1x1x16x16xf32>
    %212 = vector.shape_cast %211 : vector<1x1x16x16xf32> to vector<16x16xf32>
    %c3_207 = arith.constant 3 : index
    %c7_208 = arith.constant 7 : index
    %213 = memref.load %arg1[%c3_207, %c7_208] : memref<7x8xf32, #tpu.memory_space<smem>>
    %214 = vector.broadcast %213 : f32 to vector<16x16xf32>
    %215 = arith.mulf %212, %214 : vector<16x16xf32>
    %216 = arith.addf %210, %215 : vector<16x16xf32>
    %cst_209 = arith.constant dense<0.000000e+00> : vector<64x16xf32>
    %217 = tpu.matmul %0, %216, %cst_209 {dimension_numbers = #tpu.dot_dimension_numbers<[1], [0], [0], [1], [0, 0, 1, 1], [], []>} : vector<64x16xf32>, vector<16x16xf32>, vector<64x16xf32> -> vector<64x16xf32>
    %cst_210 = arith.constant dense<0.000000e+00> : vector<64x64xf32>
    %218 = tpu.matmul %217, %1, %cst_210 {dimension_numbers = #tpu.dot_dimension_numbers<[1], [0], [0], [1], [0, 0, 1, 1], [], []>} : vector<64x16xf32>, vector<16x64xf32>, vector<64x64xf32> -> vector<64x64xf32>
    %c0_211 = arith.constant 0 : index
    %c3_212 = arith.constant 3 : index
    %c0_213 = arith.constant 0 : index
    %c0_214 = arith.constant 0 : index
    %219 = vector.load %arg6[%c0_211, %c3_212, %c0_213, %c0_214] : memref<1x7x64x64xf32, #tpu.memory_space<vmem>>, vector<1x1x64x64xf32>
    %220 = vector.shape_cast %219 : vector<1x1x64x64xf32> to vector<64x64xf32>
    %221 = vector.shape_cast %218 : vector<64x64xf32> to vector<1x1x64x64xf32>
    tpu.vector_store %arg6[%c0_211, %c3_212, %c0_213, %c0_214], %221 {strides = array<i32>} : memref<1x7x64x64xf32, #tpu.memory_space<vmem>>, vector<1x1x64x64xf32>,
    %c0_215 = arith.constant 0 : index
    %c0_216 = arith.constant 0 : index
    %c0_217 = arith.constant 0 : index
    %c0_218 = arith.constant 0 : index
    %222 = vector.load %arg3[%c0_215, %c0_216, %c0_217, %c0_218] : memref<1x8x16x16xf32, #tpu.memory_space<vmem>>, vector<1x1x16x16xf32>
    %223 = vector.shape_cast %222 : vector<1x1x16x16xf32> to vector<16x16xf32>
    %c4_219 = arith.constant 4 : index
    %c0_220 = arith.constant 0 : index
    %224 = memref.load %arg1[%c4_219, %c0_220] : memref<7x8xf32, #tpu.memory_space<smem>>
    %225 = vector.broadcast %224 : f32 to vector<16x16xf32>
    %226 = arith.mulf %223, %225 : vector<16x16xf32>
    %c4_221 = arith.constant 4 : index
    %227 = memref.load %arg2[%c4_221] : memref<7xf32, #tpu.memory_space<smem>>
    %228 = vector.broadcast %227 : f32 to vector<16x16xf32>
    %229 = arith.addf %226, %228 : vector<16x16xf32>
    %c0_222 = arith.constant 0 : index
    %c1_223 = arith.constant 1 : index
    %c0_224 = arith.constant 0 : index
    %c0_225 = arith.constant 0 : index
    %230 = vector.load %arg3[%c0_222, %c1_223, %c0_224, %c0_225] : memref<1x8x16x16xf32, #tpu.memory_space<vmem>>, vector<1x1x16x16xf32>
    %231 = vector.shape_cast %230 : vector<1x1x16x16xf32> to vector<16x16xf32>
    %c4_226 = arith.constant 4 : index
    %c1_227 = arith.constant 1 : index
    %232 = memref.load %arg1[%c4_226, %c1_227] : memref<7x8xf32, #tpu.memory_space<smem>>
    %233 = vector.broadcast %232 : f32 to vector<16x16xf32>
    %234 = arith.mulf %231, %233 : vector<16x16xf32>
    %235 = arith.addf %229, %234 : vector<16x16xf32>
    %c0_228 = arith.constant 0 : index
    %c2_229 = arith.constant 2 : index
    %c0_230 = arith.constant 0 : index
    %c0_231 = arith.constant 0 : index
    %236 = vector.load %arg3[%c0_228, %c2_229, %c0_230, %c0_231] : memref<1x8x16x16xf32, #tpu.memory_space<vmem>>, vector<1x1x16x16xf32>
    %237 = vector.shape_cast %236 : vector<1x1x16x16xf32> to vector<16x16xf32>
    %c4_232 = arith.constant 4 : index
    %c2_233 = arith.constant 2 : index
    %238 = memref.load %arg1[%c4_232, %c2_233] : memref<7x8xf32, #tpu.memory_space<smem>>
    %239 = vector.broadcast %238 : f32 to vector<16x16xf32>
    %240 = arith.mulf %237, %239 : vector<16x16xf32>
    %241 = arith.addf %235, %240 : vector<16x16xf32>
    %c0_234 = arith.constant 0 : index
    %c3_235 = arith.constant 3 : index
    %c0_236 = arith.constant 0 : index
    %c0_237 = arith.constant 0 : index
    %242 = vector.load %arg3[%c0_234, %c3_235, %c0_236, %c0_237] : memref<1x8x16x16xf32, #tpu.memory_space<vmem>>, vector<1x1x16x16xf32>
    %243 = vector.shape_cast %242 : vector<1x1x16x16xf32> to vector<16x16xf32>
    %c4_238 = arith.constant 4 : index
    %c3_239 = arith.constant 3 : index
    %244 = memref.load %arg1[%c4_238, %c3_239] : memref<7x8xf32, #tpu.memory_space<smem>>
    %245 = vector.broadcast %244 : f32 to vector<16x16xf32>
    %246 = arith.mulf %243, %245 : vector<16x16xf32>
    %247 = arith.addf %241, %246 : vector<16x16xf32>
    %c0_240 = arith.constant 0 : index
    %c4_241 = arith.constant 4 : index
    %c0_242 = arith.constant 0 : index
    %c0_243 = arith.constant 0 : index
    %248 = vector.load %arg3[%c0_240, %c4_241, %c0_242, %c0_243] : memref<1x8x16x16xf32, #tpu.memory_space<vmem>>, vector<1x1x16x16xf32>
    %249 = vector.shape_cast %248 : vector<1x1x16x16xf32> to vector<16x16xf32>
    %c4_244 = arith.constant 4 : index
    %c4_245 = arith.constant 4 : index
    %250 = memref.load %arg1[%c4_244, %c4_245] : memref<7x8xf32, #tpu.memory_space<smem>>
    %251 = vector.broadcast %250 : f32 to vector<16x16xf32>
    %252 = arith.mulf %249, %251 : vector<16x16xf32>
    %253 = arith.addf %247, %252 : vector<16x16xf32>
    %c0_246 = arith.constant 0 : index
    %c5_247 = arith.constant 5 : index
    %c0_248 = arith.constant 0 : index
    %c0_249 = arith.constant 0 : index
    %254 = vector.load %arg3[%c0_246, %c5_247, %c0_248, %c0_249] : memref<1x8x16x16xf32, #tpu.memory_space<vmem>>, vector<1x1x16x16xf32>
    %255 = vector.shape_cast %254 : vector<1x1x16x16xf32> to vector<16x16xf32>
    %c4_250 = arith.constant 4 : index
    %c5_251 = arith.constant 5 : index
    %256 = memref.load %arg1[%c4_250, %c5_251] : memref<7x8xf32, #tpu.memory_space<smem>>
    %257 = vector.broadcast %256 : f32 to vector<16x16xf32>
    %258 = arith.mulf %255, %257 : vector<16x16xf32>
    %259 = arith.addf %253, %258 : vector<16x16xf32>
    %c0_252 = arith.constant 0 : index
    %c6_253 = arith.constant 6 : index
    %c0_254 = arith.constant 0 : index
    %c0_255 = arith.constant 0 : index
    %260 = vector.load %arg3[%c0_252, %c6_253, %c0_254, %c0_255] : memref<1x8x16x16xf32, #tpu.memory_space<vmem>>, vector<1x1x16x16xf32>
    %261 = vector.shape_cast %260 : vector<1x1x16x16xf32> to vector<16x16xf32>
    %c4_256 = arith.constant 4 : index
    %c6_257 = arith.constant 6 : index
    %262 = memref.load %arg1[%c4_256, %c6_257] : memref<7x8xf32, #tpu.memory_space<smem>>
    %263 = vector.broadcast %262 : f32 to vector<16x16xf32>
    %264 = arith.mulf %261, %263 : vector<16x16xf32>
    %265 = arith.addf %259, %264 : vector<16x16xf32>
    %c0_258 = arith.constant 0 : index
    %c7_259 = arith.constant 7 : index
    %c0_260 = arith.constant 0 : index
    %c0_261 = arith.constant 0 : index
    %266 = vector.load %arg3[%c0_258, %c7_259, %c0_260, %c0_261] : memref<1x8x16x16xf32, #tpu.memory_space<vmem>>, vector<1x1x16x16xf32>
    %267 = vector.shape_cast %266 : vector<1x1x16x16xf32> to vector<16x16xf32>
    %c4_262 = arith.constant 4 : index
    %c7_263 = arith.constant 7 : index
    %268 = memref.load %arg1[%c4_262, %c7_263] : memref<7x8xf32, #tpu.memory_space<smem>>
    %269 = vector.broadcast %268 : f32 to vector<16x16xf32>
    %270 = arith.mulf %267, %269 : vector<16x16xf32>
    %271 = arith.addf %265, %270 : vector<16x16xf32>
    %cst_264 = arith.constant dense<0.000000e+00> : vector<64x16xf32>
    %272 = tpu.matmul %0, %271, %cst_264 {dimension_numbers = #tpu.dot_dimension_numbers<[1], [0], [0], [1], [0, 0, 1, 1], [], []>} : vector<64x16xf32>, vector<16x16xf32>, vector<64x16xf32> -> vector<64x16xf32>
    %cst_265 = arith.constant dense<0.000000e+00> : vector<64x64xf32>
    %273 = tpu.matmul %272, %1, %cst_265 {dimension_numbers = #tpu.dot_dimension_numbers<[1], [0], [0], [1], [0, 0, 1, 1], [], []>} : vector<64x16xf32>, vector<16x64xf32>, vector<64x64xf32> -> vector<64x64xf32>
    %c0_266 = arith.constant 0 : index
    %c4_267 = arith.constant 4 : index
    %c0_268 = arith.constant 0 : index
    %c0_269 = arith.constant 0 : index
    %274 = vector.load %arg6[%c0_266, %c4_267, %c0_268, %c0_269] : memref<1x7x64x64xf32, #tpu.memory_space<vmem>>, vector<1x1x64x64xf32>
    %275 = vector.shape_cast %274 : vector<1x1x64x64xf32> to vector<64x64xf32>
    %276 = vector.shape_cast %273 : vector<64x64xf32> to vector<1x1x64x64xf32>
    tpu.vector_store %arg6[%c0_266, %c4_267, %c0_268, %c0_269], %276 {strides = array<i32>} : memref<1x7x64x64xf32, #tpu.memory_space<vmem>>, vector<1x1x64x64xf32>,
    %c0_270 = arith.constant 0 : index
    %c0_271 = arith.constant 0 : index
    %c0_272 = arith.constant 0 : index
    %c0_273 = arith.constant 0 : index
    %277 = vector.load %arg3[%c0_270, %c0_271, %c0_272, %c0_273] : memref<1x8x16x16xf32, #tpu.memory_space<vmem>>, vector<1x1x16x16xf32>
    %278 = vector.shape_cast %277 : vector<1x1x16x16xf32> to vector<16x16xf32>
    %c5_274 = arith.constant 5 : index
    %c0_275 = arith.constant 0 : index
    %279 = memref.load %arg1[%c5_274, %c0_275] : memref<7x8xf32, #tpu.memory_space<smem>>
    %280 = vector.broadcast %279 : f32 to vector<16x16xf32>
    %281 = arith.mulf %278, %280 : vector<16x16xf32>
    %c5_276 = arith.constant 5 : index
    %282 = memref.load %arg2[%c5_276] : memref<7xf32, #tpu.memory_space<smem>>
    %283 = vector.broadcast %282 : f32 to vector<16x16xf32>
    %284 = arith.addf %281, %283 : vector<16x16xf32>
    %c0_277 = arith.constant 0 : index
    %c1_278 = arith.constant 1 : index
    %c0_279 = arith.constant 0 : index
    %c0_280 = arith.constant 0 : index
    %285 = vector.load %arg3[%c0_277, %c1_278, %c0_279, %c0_280] : memref<1x8x16x16xf32, #tpu.memory_space<vmem>>, vector<1x1x16x16xf32>
    %286 = vector.shape_cast %285 : vector<1x1x16x16xf32> to vector<16x16xf32>
    %c5_281 = arith.constant 5 : index
    %c1_282 = arith.constant 1 : index
    %287 = memref.load %arg1[%c5_281, %c1_282] : memref<7x8xf32, #tpu.memory_space<smem>>
    %288 = vector.broadcast %287 : f32 to vector<16x16xf32>
    %289 = arith.mulf %286, %288 : vector<16x16xf32>
    %290 = arith.addf %284, %289 : vector<16x16xf32>
    %c0_283 = arith.constant 0 : index
    %c2_284 = arith.constant 2 : index
    %c0_285 = arith.constant 0 : index
    %c0_286 = arith.constant 0 : index
    %291 = vector.load %arg3[%c0_283, %c2_284, %c0_285, %c0_286] : memref<1x8x16x16xf32, #tpu.memory_space<vmem>>, vector<1x1x16x16xf32>
    %292 = vector.shape_cast %291 : vector<1x1x16x16xf32> to vector<16x16xf32>
    %c5_287 = arith.constant 5 : index
    %c2_288 = arith.constant 2 : index
    %293 = memref.load %arg1[%c5_287, %c2_288] : memref<7x8xf32, #tpu.memory_space<smem>>
    %294 = vector.broadcast %293 : f32 to vector<16x16xf32>
    %295 = arith.mulf %292, %294 : vector<16x16xf32>
    %296 = arith.addf %290, %295 : vector<16x16xf32>
    %c0_289 = arith.constant 0 : index
    %c3_290 = arith.constant 3 : index
    %c0_291 = arith.constant 0 : index
    %c0_292 = arith.constant 0 : index
    %297 = vector.load %arg3[%c0_289, %c3_290, %c0_291, %c0_292] : memref<1x8x16x16xf32, #tpu.memory_space<vmem>>, vector<1x1x16x16xf32>
    %298 = vector.shape_cast %297 : vector<1x1x16x16xf32> to vector<16x16xf32>
    %c5_293 = arith.constant 5 : index
    %c3_294 = arith.constant 3 : index
    %299 = memref.load %arg1[%c5_293, %c3_294] : memref<7x8xf32, #tpu.memory_space<smem>>
    %300 = vector.broadcast %299 : f32 to vector<16x16xf32>
    %301 = arith.mulf %298, %300 : vector<16x16xf32>
    %302 = arith.addf %296, %301 : vector<16x16xf32>
    %c0_295 = arith.constant 0 : index
    %c4_296 = arith.constant 4 : index
    %c0_297 = arith.constant 0 : index
    %c0_298 = arith.constant 0 : index
    %303 = vector.load %arg3[%c0_295, %c4_296, %c0_297, %c0_298] : memref<1x8x16x16xf32, #tpu.memory_space<vmem>>, vector<1x1x16x16xf32>
    %304 = vector.shape_cast %303 : vector<1x1x16x16xf32> to vector<16x16xf32>
    %c5_299 = arith.constant 5 : index
    %c4_300 = arith.constant 4 : index
    %305 = memref.load %arg1[%c5_299, %c4_300] : memref<7x8xf32, #tpu.memory_space<smem>>
    %306 = vector.broadcast %305 : f32 to vector<16x16xf32>
    %307 = arith.mulf %304, %306 : vector<16x16xf32>
    %308 = arith.addf %302, %307 : vector<16x16xf32>
    %c0_301 = arith.constant 0 : index
    %c5_302 = arith.constant 5 : index
    %c0_303 = arith.constant 0 : index
    %c0_304 = arith.constant 0 : index
    %309 = vector.load %arg3[%c0_301, %c5_302, %c0_303, %c0_304] : memref<1x8x16x16xf32, #tpu.memory_space<vmem>>, vector<1x1x16x16xf32>
    %310 = vector.shape_cast %309 : vector<1x1x16x16xf32> to vector<16x16xf32>
    %c5_305 = arith.constant 5 : index
    %c5_306 = arith.constant 5 : index
    %311 = memref.load %arg1[%c5_305, %c5_306] : memref<7x8xf32, #tpu.memory_space<smem>>
    %312 = vector.broadcast %311 : f32 to vector<16x16xf32>
    %313 = arith.mulf %310, %312 : vector<16x16xf32>
    %314 = arith.addf %308, %313 : vector<16x16xf32>
    %c0_307 = arith.constant 0 : index
    %c6_308 = arith.constant 6 : index
    %c0_309 = arith.constant 0 : index
    %c0_310 = arith.constant 0 : index
    %315 = vector.load %arg3[%c0_307, %c6_308, %c0_309, %c0_310] : memref<1x8x16x16xf32, #tpu.memory_space<vmem>>, vector<1x1x16x16xf32>
    %316 = vector.shape_cast %315 : vector<1x1x16x16xf32> to vector<16x16xf32>
    %c5_311 = arith.constant 5 : index
    %c6_312 = arith.constant 6 : index
    %317 = memref.load %arg1[%c5_311, %c6_312] : memref<7x8xf32, #tpu.memory_space<smem>>
    %318 = vector.broadcast %317 : f32 to vector<16x16xf32>
    %319 = arith.mulf %316, %318 : vector<16x16xf32>
    %320 = arith.addf %314, %319 : vector<16x16xf32>
    %c0_313 = arith.constant 0 : index
    %c7_314 = arith.constant 7 : index
    %c0_315 = arith.constant 0 : index
    %c0_316 = arith.constant 0 : index
    %321 = vector.load %arg3[%c0_313, %c7_314, %c0_315, %c0_316] : memref<1x8x16x16xf32, #tpu.memory_space<vmem>>, vector<1x1x16x16xf32>
    %322 = vector.shape_cast %321 : vector<1x1x16x16xf32> to vector<16x16xf32>
    %c5_317 = arith.constant 5 : index
    %c7_318 = arith.constant 7 : index
    %323 = memref.load %arg1[%c5_317, %c7_318] : memref<7x8xf32, #tpu.memory_space<smem>>
    %324 = vector.broadcast %323 : f32 to vector<16x16xf32>
    %325 = arith.mulf %322, %324 : vector<16x16xf32>
    %326 = arith.addf %320, %325 : vector<16x16xf32>
    %cst_319 = arith.constant dense<0.000000e+00> : vector<64x16xf32>
    %327 = tpu.matmul %0, %326, %cst_319 {dimension_numbers = #tpu.dot_dimension_numbers<[1], [0], [0], [1], [0, 0, 1, 1], [], []>} : vector<64x16xf32>, vector<16x16xf32>, vector<64x16xf32> -> vector<64x16xf32>
    %cst_320 = arith.constant dense<0.000000e+00> : vector<64x64xf32>
    %328 = tpu.matmul %327, %1, %cst_320 {dimension_numbers = #tpu.dot_dimension_numbers<[1], [0], [0], [1], [0, 0, 1, 1], [], []>} : vector<64x16xf32>, vector<16x64xf32>, vector<64x64xf32> -> vector<64x64xf32>
    %c0_321 = arith.constant 0 : index
    %c5_322 = arith.constant 5 : index
    %c0_323 = arith.constant 0 : index
    %c0_324 = arith.constant 0 : index
    %329 = vector.load %arg6[%c0_321, %c5_322, %c0_323, %c0_324] : memref<1x7x64x64xf32, #tpu.memory_space<vmem>>, vector<1x1x64x64xf32>
    %330 = vector.shape_cast %329 : vector<1x1x64x64xf32> to vector<64x64xf32>
    %331 = vector.shape_cast %328 : vector<64x64xf32> to vector<1x1x64x64xf32>
    tpu.vector_store %arg6[%c0_321, %c5_322, %c0_323, %c0_324], %331 {strides = array<i32>} : memref<1x7x64x64xf32, #tpu.memory_space<vmem>>, vector<1x1x64x64xf32>,
    %c0_325 = arith.constant 0 : index
    %c0_326 = arith.constant 0 : index
    %c0_327 = arith.constant 0 : index
    %c0_328 = arith.constant 0 : index
    %332 = vector.load %arg3[%c0_325, %c0_326, %c0_327, %c0_328] : memref<1x8x16x16xf32, #tpu.memory_space<vmem>>, vector<1x1x16x16xf32>
    %333 = vector.shape_cast %332 : vector<1x1x16x16xf32> to vector<16x16xf32>
    %c6_329 = arith.constant 6 : index
    %c0_330 = arith.constant 0 : index
    %334 = memref.load %arg1[%c6_329, %c0_330] : memref<7x8xf32, #tpu.memory_space<smem>>
    %335 = vector.broadcast %334 : f32 to vector<16x16xf32>
    %336 = arith.mulf %333, %335 : vector<16x16xf32>
    %c6_331 = arith.constant 6 : index
    %337 = memref.load %arg2[%c6_331] : memref<7xf32, #tpu.memory_space<smem>>
    %338 = vector.broadcast %337 : f32 to vector<16x16xf32>
    %339 = arith.addf %336, %338 : vector<16x16xf32>
    %c0_332 = arith.constant 0 : index
    %c1_333 = arith.constant 1 : index
    %c0_334 = arith.constant 0 : index
    %c0_335 = arith.constant 0 : index
    %340 = vector.load %arg3[%c0_332, %c1_333, %c0_334, %c0_335] : memref<1x8x16x16xf32, #tpu.memory_space<vmem>>, vector<1x1x16x16xf32>
    %341 = vector.shape_cast %340 : vector<1x1x16x16xf32> to vector<16x16xf32>
    %c6_336 = arith.constant 6 : index
    %c1_337 = arith.constant 1 : index
    %342 = memref.load %arg1[%c6_336, %c1_337] : memref<7x8xf32, #tpu.memory_space<smem>>
    %343 = vector.broadcast %342 : f32 to vector<16x16xf32>
    %344 = arith.mulf %341, %343 : vector<16x16xf32>
    %345 = arith.addf %339, %344 : vector<16x16xf32>
    %c0_338 = arith.constant 0 : index
    %c2_339 = arith.constant 2 : index
    %c0_340 = arith.constant 0 : index
    %c0_341 = arith.constant 0 : index
    %346 = vector.load %arg3[%c0_338, %c2_339, %c0_340, %c0_341] : memref<1x8x16x16xf32, #tpu.memory_space<vmem>>, vector<1x1x16x16xf32>
    %347 = vector.shape_cast %346 : vector<1x1x16x16xf32> to vector<16x16xf32>
    %c6_342 = arith.constant 6 : index
    %c2_343 = arith.constant 2 : index
    %348 = memref.load %arg1[%c6_342, %c2_343] : memref<7x8xf32, #tpu.memory_space<smem>>
    %349 = vector.broadcast %348 : f32 to vector<16x16xf32>
    %350 = arith.mulf %347, %349 : vector<16x16xf32>
    %351 = arith.addf %345, %350 : vector<16x16xf32>
    %c0_344 = arith.constant 0 : index
    %c3_345 = arith.constant 3 : index
    %c0_346 = arith.constant 0 : index
    %c0_347 = arith.constant 0 : index
    %352 = vector.load %arg3[%c0_344, %c3_345, %c0_346, %c0_347] : memref<1x8x16x16xf32, #tpu.memory_space<vmem>>, vector<1x1x16x16xf32>
    %353 = vector.shape_cast %352 : vector<1x1x16x16xf32> to vector<16x16xf32>
    %c6_348 = arith.constant 6 : index
    %c3_349 = arith.constant 3 : index
    %354 = memref.load %arg1[%c6_348, %c3_349] : memref<7x8xf32, #tpu.memory_space<smem>>
    %355 = vector.broadcast %354 : f32 to vector<16x16xf32>
    %356 = arith.mulf %353, %355 : vector<16x16xf32>
    %357 = arith.addf %351, %356 : vector<16x16xf32>
    %c0_350 = arith.constant 0 : index
    %c4_351 = arith.constant 4 : index
    %c0_352 = arith.constant 0 : index
    %c0_353 = arith.constant 0 : index
    %358 = vector.load %arg3[%c0_350, %c4_351, %c0_352, %c0_353] : memref<1x8x16x16xf32, #tpu.memory_space<vmem>>, vector<1x1x16x16xf32>
    %359 = vector.shape_cast %358 : vector<1x1x16x16xf32> to vector<16x16xf32>
    %c6_354 = arith.constant 6 : index
    %c4_355 = arith.constant 4 : index
    %360 = memref.load %arg1[%c6_354, %c4_355] : memref<7x8xf32, #tpu.memory_space<smem>>
    %361 = vector.broadcast %360 : f32 to vector<16x16xf32>
    %362 = arith.mulf %359, %361 : vector<16x16xf32>
    %363 = arith.addf %357, %362 : vector<16x16xf32>
    %c0_356 = arith.constant 0 : index
    %c5_357 = arith.constant 5 : index
    %c0_358 = arith.constant 0 : index
    %c0_359 = arith.constant 0 : index
    %364 = vector.load %arg3[%c0_356, %c5_357, %c0_358, %c0_359] : memref<1x8x16x16xf32, #tpu.memory_space<vmem>>, vector<1x1x16x16xf32>
    %365 = vector.shape_cast %364 : vector<1x1x16x16xf32> to vector<16x16xf32>
    %c6_360 = arith.constant 6 : index
    %c5_361 = arith.constant 5 : index
    %366 = memref.load %arg1[%c6_360, %c5_361] : memref<7x8xf32, #tpu.memory_space<smem>>
    %367 = vector.broadcast %366 : f32 to vector<16x16xf32>
    %368 = arith.mulf %365, %367 : vector<16x16xf32>
    %369 = arith.addf %363, %368 : vector<16x16xf32>
    %c0_362 = arith.constant 0 : index
    %c6_363 = arith.constant 6 : index
    %c0_364 = arith.constant 0 : index
    %c0_365 = arith.constant 0 : index
    %370 = vector.load %arg3[%c0_362, %c6_363, %c0_364, %c0_365] : memref<1x8x16x16xf32, #tpu.memory_space<vmem>>, vector<1x1x16x16xf32>
    %371 = vector.shape_cast %370 : vector<1x1x16x16xf32> to vector<16x16xf32>
    %c6_366 = arith.constant 6 : index
    %c6_367 = arith.constant 6 : index
    %372 = memref.load %arg1[%c6_366, %c6_367] : memref<7x8xf32, #tpu.memory_space<smem>>
    %373 = vector.broadcast %372 : f32 to vector<16x16xf32>
    %374 = arith.mulf %371, %373 : vector<16x16xf32>
    %375 = arith.addf %369, %374 : vector<16x16xf32>
    %c0_368 = arith.constant 0 : index
    %c7_369 = arith.constant 7 : index
    %c0_370 = arith.constant 0 : index
    %c0_371 = arith.constant 0 : index
    %376 = vector.load %arg3[%c0_368, %c7_369, %c0_370, %c0_371] : memref<1x8x16x16xf32, #tpu.memory_space<vmem>>, vector<1x1x16x16xf32>
    %377 = vector.shape_cast %376 : vector<1x1x16x16xf32> to vector<16x16xf32>
    %c6_372 = arith.constant 6 : index
    %c7_373 = arith.constant 7 : index
    %378 = memref.load %arg1[%c6_372, %c7_373] : memref<7x8xf32, #tpu.memory_space<smem>>
    %379 = vector.broadcast %378 : f32 to vector<16x16xf32>
    %380 = arith.mulf %377, %379 : vector<16x16xf32>
    %381 = arith.addf %375, %380 : vector<16x16xf32>
    %cst_374 = arith.constant dense<0.000000e+00> : vector<64x16xf32>
    %382 = tpu.matmul %0, %381, %cst_374 {dimension_numbers = #tpu.dot_dimension_numbers<[1], [0], [0], [1], [0, 0, 1, 1], [], []>} : vector<64x16xf32>, vector<16x16xf32>, vector<64x16xf32> -> vector<64x16xf32>
    %cst_375 = arith.constant dense<0.000000e+00> : vector<64x64xf32>
    %383 = tpu.matmul %382, %1, %cst_375 {dimension_numbers = #tpu.dot_dimension_numbers<[1], [0], [0], [1], [0, 0, 1, 1], [], []>} : vector<64x16xf32>, vector<16x64xf32>, vector<64x64xf32> -> vector<64x64xf32>
    %c0_376 = arith.constant 0 : index
    %c6_377 = arith.constant 6 : index
    %c0_378 = arith.constant 0 : index
    %c0_379 = arith.constant 0 : index
    %384 = vector.load %arg6[%c0_376, %c6_377, %c0_378, %c0_379] : memref<1x7x64x64xf32, #tpu.memory_space<vmem>>, vector<1x1x64x64xf32>
    %385 = vector.shape_cast %384 : vector<1x1x64x64xf32> to vector<64x64xf32>
    %386 = vector.shape_cast %383 : vector<64x64xf32> to vector<1x1x64x64xf32>
    tpu.vector_store %arg6[%c0_376, %c6_377, %c0_378, %c0_379], %386 {strides = array<i32>} : memref<1x7x64x64xf32, #tpu.memory_space<vmem>>, vector<1x1x64x64xf32>,
    return
  }
  func.func @transform_0(%arg0: i32) -> (i32, i32) {
    %c0_i32 = arith.constant 0 : i32
    %c0_i32_0 = arith.constant 0 : i32
    %c0_i32_1 = arith.constant 0 : i32
    return %c0_i32, %c0_i32_0 : i32, i32
  }
  func.func @transform_1(%arg0: i32) -> i32 {
    %c0_i32 = arith.constant 0 : i32
    %c0_i32_0 = arith.constant 0 : i32
    return %c0_i32 : i32
  }
  func.func @transform_2(%arg0: i32) -> (i32, i32, i32, i32) {
    %c0_i32 = arith.constant 0 : i32
    %c0_i32_0 = arith.constant 0 : i32
    %c0_i32_1 = arith.constant 0 : i32
    %c0_i32_2 = arith.constant 0 : i32
    return %arg0, %c0_i32, %c0_i32_0, %c0_i32_1 : i32, i32, i32, i32
  }
  func.func @transform_3(%arg0: i32) -> (i32, i32) {
    %c0_i32 = arith.constant 0 : i32
    %c0_i32_0 = arith.constant 0 : i32
    %c0_i32_1 = arith.constant 0 : i32
    return %c0_i32, %c0_i32_0 : i32, i32
  }
  func.func @transform_4(%arg0: i32) -> (i32, i32) {
    %c0_i32 = arith.constant 0 : i32
    %c0_i32_0 = arith.constant 0 : i32
    %c0_i32_1 = arith.constant 0 : i32
    return %c0_i32, %c0_i32_0 : i32, i32
  }
  func.func @transform_5(%arg0: i32) -> (i32, i32, i32, i32) {
    %c0_i32 = arith.constant 0 : i32
    %c0_i32_0 = arith.constant 0 : i32
    %c0_i32_1 = arith.constant 0 : i32
    %c0_i32_2 = arith.constant 0 : i32
    return %arg0, %c0_i32, %c0_i32_0, %c0_i32_1 : i32, i32, i32, i32
  }
}

</mosaic_0001>

<bundles_post_ra>
// kernel: _seg_detector_pallas.1
= control target key start
LH: loop header
LB: loop body
LE: loop exit
PB: predicated region body
PF: predicated region fallthrough
CT: control target
= control target key end

     0   :  { %10 = vsyncpa [#allocation4], 0  ;;  %s4302_s0 = inlined_call_operand.vmem [shape: f32[7,8], index: 0, kind: input, shape index: {}]   ;;  %s4303_s1 = inlined_call_operand.vmem [shape: f32[7], index: 1, kind: input, shape index: {}]   ;;  %s4304_s2 = inlined_call_operand.vmem [shape: f32[2,8,16,16], index: 2, kind: input, shape index: {}]   ;;  %s4305_s3 = inlined_call_operand.vmem [shape: f32[64,16], index: 3, kind: input, shape index: {}]   ;;  %s4306_s4 = inlined_call_operand.vmem [shape: f32[16,64], index: 4, kind: input, shape index: {}]   ;;  %s4307_s5 = inlined_call_operand.hbm [shape: f32[2,7,64,64], index: 5, kind: output, shape index: {}]  }
   0x1   :  { %11 = vsyncpa [#allocation6], 0 }
   0x2   :  { %12 = vsyncpa [#allocation3], 0 }
   0x3   :  { %14 = vsyncpa [#allocation3 + $0x1], 0  ;;  %s3449_s18 = smov 0   ;;  %s3451_s19 = smov 0  }
   0x4   :  { %s3453_s20 = smov 0   ;;  %s3455_s21 = smov 0  }
   0x5 LB: > { %s3470_s22 = sadd.s32 4294967295, %s3412_s21   ;;  %s2553_s23 = sadd.s32 4294967294, %s3412_s21   ;;  %s3412_s21 = sphi %s3455_s21, %s4325_s21   ;;  %s3408_s20 = sphi %s3453_s20, %s4324_s20   ;;  %s3404_s19 = sphi %s3451_s19, %s4323_s19   ;;  %s3400_s18 = sphi %s3449_s18, %s4322_s18  }
   0x6   : > { %s3474_s24 = sadd.s32 1, %s3412_s21   ;;  %s137_s25 = sadd.s32 1, %s3408_s20 }
   0x7   : > { %s134_s26 = ssub.s32 %s3412_s21, %s3474_s24  ;;  %p147_p0 = scmp.ne.s32.totalorder %s3408_s20, %s3404_s19 }
   0x8   : > { %p135_p1 = scmp.eq.s32.totalorder %s134_s26, 0  ;;  %p148_p2 = scmp.eq.s32.totalorder %s3470_s22, 1 }
   0x9   : > { %p153_p3 = scmp.ne.s32.totalorder %s3404_s19, %s3400_s18  ;;  %p154_p4 = scmp.eq.s32.totalorder %s2553_s23, 1 }
   0xa   : > { %s3485_s27 = scalar_select %p135_p1, %s3408_s20, %s137_s25  }
   0xb   : > { %p3487_p5 = por %p148_p2, %p147_p0  ;;  %p3491_p6 = por %p154_p4, %p153_p3 }
   0xc   : > { %p2554_p7 = scmp.ge.s32.totalorder %s3412_s21, 1  ;;  %p161_p8 = scmp.lt.s32.totalorder %s3412_s21, 3 }
   0xd   : > { %s4311_s28 = scalar_select %p3487_p5, 1, 0 }
   0xe   : > { %s4312_s29 = scalar_select %p3491_p6, 1, 0 }
   0xf   : > { %p4308_p9 = scmp.eq.s32.totalorder %s3470_s22, 0  ;;  %p3498_p10 = pnand %p2554_p7, %p161_p8 }
  0x10   : > { %s174_s8 = sshll.u32 %s4302_s0, 4  ;;  %s185_s11 = sshll.u32 %s4303_s1, 4  ;;  %s175_s8 = int_to_ptr.vmem [resolvable:$true] %s174_s8  ;;  %s186_s11 = int_to_ptr.vmem [resolvable:$true] %s185_s11 }
  0x11   : > { %s4313_s30 = scalar_select %p3498_p10, 1, 0 }
  0x12   : > { %p3262_p11 = pneg %p3498_p10  ;;  %s3314_s13 = scalar_lea.vmem %s175_s8, 128 }
  0x13   : > { %p3315_p13 = scmp.ne.s32.totalorder %s175_s8, %s3314_s13  ;;  %p3322_p3 = scmp.lt.s32.totalorder %s175_s8, %s175_s8 }
  0x14   : > { %p3512_p12 = pnand %p4308_p9, %p3262_p11  ;;  %p3323_p4 = scmp.lt.s32.totalorder %s3314_s13, %s3314_s13 }
  0x16   : > { %p3316_p0 = pneg %p3512_p12  ;;  %p3324_p7 = por %p3323_p4, %p3322_p3 }
  0x18   : > { %p3317_p1 = pnand %p3316_p0, %p3315_p13 }
  0x1a   : > { %p3318_p2 = pneg %p3317_p1 }
  0x1c   : > { %p3325_p8 = pnand %p3324_p7, %p3318_p2 }
  0x1e   : > { %3328 = shalt.err (!%p3325_p8)
}
  0x1f   : > { %s3414_s14 = smov [#allocation2]   ;;  %s3329_s15 = scalar_lea.vmem %s186_s11, 16 }
  0x20   : > { %3265 = dma.vmem_to_smem (!%p3512_p12), %s175_s8, 128, %s3414_s14, [#allocation4]  }
  0x21   : > { %p3330_p11 = scmp.ne.s32.totalorder %s186_s11, %s3329_s15  ;;  %p3337_p5 = scmp.lt.s32.totalorder %s186_s11, %s186_s11 }
  0x22   : > { %p3338_p10 = scmp.lt.s32.totalorder %s3329_s15, %s3329_s15 }
  0x23   : > { %p3332_p9 = pnand %p3330_p11, %p3316_p0 }
  0x24   : > { %p3339_p13 = por %p3338_p10, %p3337_p5 }
  0x25   : > { %p3333_p6 = pneg %p3332_p9 }
  0x27   : > { %p3340_p1 = pnand %p3339_p13, %p3333_p6 }
  0x29   : > { %3343 = shalt.err (!%p3340_p1)
}
  0x2a   : > { %s3415_s16 = smov [#allocation5]   ;;  %p4315_p2 = scmp.ne.s32.totalorder %s4313_s30, 0 }
  0x2b   : > { %3268 = dma.vmem_to_smem (!%p3512_p12), %s186_s11, 16, %s3415_s16, [#allocation6]  }
  0x2c   : > { %212 = sbr.rel (%p4315_p2) target bundleno = 599 (0x257), region = 40  ;;  %p4316_p3 = scmp.eq.s32.totalorder (!%p4315_p2), %s3470_s22, 0 }
  0x31   : > { %3387 = dma.done.wait (%p4316_p3), [#allocation4], 128   ;;  %p4317_p4 = pmov %p4316_p3 }
  0x32   : > { %p4318_p9 = pmov %p4316_p3 }
  0x33   : > { %3389 = vsyncadd (%p4317_p4), [#allocation4], 4294967168 }
  0x34   : > { %3391 = dma.done.wait (%p4318_p9), [#allocation6], 16   ;;  %p4319_p5 = pmov %p4316_p3 }
  0x36   : > { %3393 = vsyncadd (%p4319_p5), [#allocation6], 4294967280 }
  0x37   : > { %222 = sfence }
  0x38   : > { %p245_p6 = scmp.lt.s32.totalorder %s3470_s22, 1  ;;  %s262_s17 = sld [smem:[#allocation2]]  ;;  %v3536_v0 = vld [vmem:[%s4305_s3] sm:$0xff]  ;;  %vm333_vm0 = vcmask 130048   ;;  %vm592_vm1 = vcmask 523264  }
  0x39   : > { %s266_s26 = sld [smem:[#allocation5]]  ;;  %3030 = vmatprep.mubr.msk.f32.mxu0 %vm333_vm0, %v3536_v0  ;;  %p4320_p12 = scmp.ne.s32.totalorder %s4311_s28, 0 }
  0x3a   : > { %s246_s30 = scalar_select %p245_p6, %s3470_s22, 1 }
  0x3b   : > { %s2565_s6 = sld [smem:[#allocation2 + $0x1]] }
  0x3c   : > { %s2885_s7 = sshll.u32 %s246_s30, 7  ;;  %s2568_s8 = sld [smem:[#allocation2 + $0x2]] }
  0x3d   : > { %s3544_s11 = scalar_lea.vmem %s4304_s2, %s2885_s7  ;;  %s3546_s12 = sld [smem:[#allocation2 + $0x3]] }
  0x3e   : > { %v3549_v1 = vld [vmem:[%s3544_s11] sm:$0xff]  ;;  %v3552_v2 = vld [vmem:[%s3544_s11 + $0x8] sm:$0xff]  ;;  %v263_v3 = vstv %s262_s17  ;;  %s3554_s13 = sld [smem:[#allocation2 + $0x4]]  ;;  %v3559_v7 = vld [vmem:[%s3544_s11 + $0x10] sm:$0xff] }
  0x3f   : > { %v264_v4 = vmul.f32 %v263_v3, %v3549_v1  ;;  %v265_v5 = vmul.f32 %v263_v3, %v3552_v2  ;;  %v267_v6 = vstv %s266_s26  ;;  %v3562_v8 = vld [vmem:[%s3544_s11 + $0x18] sm:$0xff]  ;;  %s3564_s14 = sld [smem:[#allocation2 + $0x5]]  ;;  %v3567_v9 = vld [vmem:[%s3544_s11 + $0x20] sm:$0xff]  ;;  %v3570_v10 = vld [vmem:[%s3544_s11 + $0x28] sm:$0xff] }
  0x40   : > { %s3572_s15 = sld [smem:[#allocation2 + $0x6]]  ;;  %v3575_v14 = vld [vmem:[%s3544_s11 + $0x38] sm:$0xff]  ;;  %v3582_v18 = vld [vmem:[%s3544_s11 + $0x30] sm:$0xff]  ;;  %v3590_v22 = vld [vmem:[%s3544_s11 + $0x40] sm:$0xff] }
  0x41   : > { %v268_v11 = vadd.f32 %v267_v6, %v264_v4  ;;  %v269_v12 = vadd.f32 %v267_v6, %v265_v5  ;;  %v274_v13 = vstv %s2565_s6  ;;  %s3577_s16 = sld [smem:[#allocation2 + $0x7]]  ;;  %v3593_v23 = vld [vmem:[%s3544_s11 + $0x48] sm:$0xff]  ;;  %v3600_v27 = vld [vmem:[%s3544_s11 + $0x50] sm:$0xff]  ;;  %v3603_v28 = vld [vmem:[%s3544_s11 + $0x58] sm:$0xff] }
  0x42   : > { %v275_v15 = vmul.f32 %v3559_v7, %v274_v13  ;;  %v276_v16 = vmul.f32 %v3562_v8, %v274_v13  ;;  %v283_v17 = vstv %s2568_s8  ;;  %s3584_s17 = sld [smem:[#allocation2 + $0x80]]  ;;  %v3610_v31 = vld [vmem:[%s3544_s11 + $0x60] sm:$0xff]  ;;  %v3613_v32 = vld [vmem:[%s3544_s11 + $0x68] sm:$0xff]  ;;  %v3625_v40 = vld [vmem:[%s3544_s11 + $0x70] sm:$0xff] }
  0x43   : > { %v284_v19 = vmul.f32 %v3567_v9, %v283_v17  ;;  %v285_v20 = vmul.f32 %v3570_v10, %v283_v17  ;;  %v292_v21 = vstv %s3546_s12  ;;  %s3595_s23 = sld [smem:[#allocation5 + $0x1]]  ;;  %v3628_v41 = vld [vmem:[%s3544_s11 + $0x78] sm:$0xff] }
  0x44   : > { %v278_v24 = vadd.f32 %v276_v16, %v269_v12  ;;  %v294_v25 = vmul.f32 %v3575_v14, %v292_v21  ;;  %v301_v26 = vstv %s3554_s13  ;;  %s3605_s25 = sld [smem:[#allocation2 + $0x81]]  ;;  %v293_v29 = vmul.f32 %v3582_v18, %v292_v21 }
  0x45   : > { %v310_v30 = vstv %s3564_s14  ;;  %v277_v33 = vadd.f32 %v275_v15, %v268_v11  ;;  %s3615_s26 = sld [smem:[#allocation2 + $0x82]]  ;;  %v302_v35 = vmul.f32 %v3590_v22, %v301_v26  ;;  %v303_v36 = vmul.f32 %v3593_v23, %v301_v26 }
  0x46   : > { %v287_v34 = vadd.f32 %v285_v20, %v278_v24  ;;  %v319_v37 = vstv %s3572_s15  ;;  %s3620_s30 = sld [smem:[#allocation2 + $0x83]]  ;;  %v311_v38 = vmul.f32 %v3600_v27, %v310_v30  ;;  %v312_v39 = vmul.f32 %v3603_v28, %v310_v30 }
  0x47   : > { %v328_v42 = vstv %s3577_s16  ;;  %v286_v43 = vadd.f32 %v284_v19, %v277_v33  ;;  %s3631_s6 = sld [smem:[#allocation2 + $0x84]]  ;;  %v320_v45 = vmul.f32 %v3610_v31, %v319_v37  ;;  %v321_v46 = vmul.f32 %v3613_v32, %v319_v37  ;;  %v3684_v37 = vld [vmem:[%s4305_s3 + $0x8] sm:$0xff] }
  0x48   : > { %v296_v44 = vadd.f32 %v294_v25, %v287_v34  ;;  %v604_v47 = vstv %s3584_s17  ;;  %s3636_s7 = sld [smem:[#allocation2 + $0x85]]  ;;  %v329_v53 = vmul.f32 %v3625_v40, %v328_v42  ;;  %v330_v54 = vmul.f32 %v3628_v41, %v328_v42 }
  0x49   : > { %v295_v48 = vadd.f32 %v293_v29, %v286_v43  ;;  %v606_v49 = vmul.f32 %v604_v47, %v3552_v2  ;;  %v608_v50 = vstv %s3595_s23  ;;  %s3640_s8 = sld [smem:[#allocation2 + $0x86]]  ;;  %v605_v51 = vmul.f32 %v604_v47, %v3549_v1 }
  0x4a   : > { %v305_v52 = vadd.f32 %v303_v36, %v296_v44  ;;  %v614_v55 = vstv %s3605_s25  ;;  %s3646_s9 = sld [smem:[#allocation2 + $0x87]]  ;;  %v3693_v44 = vld [vmem:[%s4305_s3 + $0x10] sm:$0xff] }
  0x4b   : > { %v304_v56 = vadd.f32 %v302_v35, %v295_v48  ;;  %v610_v57 = vadd.f32 %v608_v50, %v606_v49  ;;  %v616_v58 = vmul.f32 %v3562_v8, %v614_v55  ;;  %v622_v59 = vstv %s3615_s26  ;;  %s3650_s10 = sld [smem:[#allocation2 + $0x100]] }
  0x4c   : > { %v314_v60 = vadd.f32 %v312_v39, %v305_v52  ;;  %v624_v61 = vmul.f32 %v3570_v10, %v622_v59  ;;  %v630_v62 = vstv %s3620_s30  ;;  %v609_v63 = vadd.f32 %v608_v50, %v605_v51  ;;  %s3654_s12 = sld [smem:[#allocation5 + $0x2]] }
  0x4d   : > { %v313_v3 = vadd.f32 %v311_v38, %v304_v56  ;;  %v618_v4 = vadd.f32 %v616_v58, %v610_v57  ;;  %v632_v5 = vmul.f32 %v3575_v14, %v630_v62  ;;  %v638_v6 = vstv %s3631_s6  ;;  %s3658_s13 = sld [smem:[#allocation2 + $0x101]]  ;;  %v3717_v58 = vld [vmem:[%s4305_s3 + $0x18] sm:$0xff] }
  0x4e   : > { %v323_v11 = vadd.f32 %v321_v46, %v314_v60  ;;  %v646_v12 = vstv %s3636_s7  ;;  %v615_v13 = vmul.f32 %v3559_v7, %v614_v55  ;;  %s3662_s14 = sld [smem:[#allocation2 + $0x102]]  ;;  %v640_v17 = vmul.f32 %v3593_v23, %v638_v6 }
  0x4f   : > { %v322_v15 = vadd.f32 %v320_v45, %v313_v3  ;;  %v626_v16 = vadd.f32 %v624_v61, %v618_v4  ;;  %v654_v19 = vstv %s3640_s8  ;;  %s3666_s15 = sld [smem:[#allocation2 + $0x103]]  ;;  %v648_v29 = vmul.f32 %v3603_v28, %v646_v12 }
  0x50   : > { %v332_v20 = vadd.f32 %v330_v54, %v323_v11  ;;  %v662_v21 = vstv %s3646_s9  ;;  %v617_v24 = vadd.f32 %v615_v13, %v609_v63  ;;  %s3669_s16 = sld [smem:[#allocation2 + $0x104]]  ;;  %v623_v30 = vmul.f32 %v3567_v9, %v622_v59 }
  0x51   : > { %v331_v25 = vadd.f32 %v329_v53, %v322_v15  ;;  %v634_v26 = vadd.f32 %v632_v5, %v626_v16  ;;  %s3673_s17 = sld [smem:[#allocation2 + $0x105]]  ;;  %v656_v33 = vmul.f32 %v3613_v32, %v654_v19  ;;  %v664_v34 = vmul.f32 %v3628_v41, %v662_v21 }
  0x52   : > { %3026 = vmatprep.subr.mxu0 %v332_v20  ;;  %v631_v35 = vmul.f32 %v3582_v18, %v630_v62  ;;  %v639_v36 = vmul.f32 %v3590_v22, %v638_v6  ;;  %s3679_s23 = sld [smem:[#allocation2 + $0x106]]  ;;  %v625_v39 = vadd.f32 %v623_v30, %v617_v24  ;;  %v647_v42 = vmul.f32 %v3600_v27, %v646_v12  ;;  %v3726_v62 = vld [vmem:[%s4305_s3 + $0x20] sm:$0xff] }
  0x53   : > { %3027 = vmatpush3.msra.mxu0 %v332_v20  ;;  %v642_v38 = vadd.f32 %v640_v17, %v634_v26  ;;  %v913_v43 = vstv %s3650_s10  ;;  %s3688_s30 = sld [smem:[#allocation2 + $0x107]]  ;;  %v917_v46 = vstv %s3654_s12  ;;  %v923_v47 = vstv %s3658_s13  ;;  %v3748_v20 = vld [vmem:[%s4305_s3 + $0x28] sm:$0xff] }
  0x54   : > { %3028 = vmatprep.subr.mxu0 %v331_v25  ;;  %v915_v45 = vmul.f32 %v913_v43, %v3552_v2  ;;  %v931_v48 = vstv %s3662_s14  ;;  %s3699_s8 = sld [smem:[#allocation2 + $0x180]]  ;;  %v633_v50 = vadd.f32 %v631_v35, %v625_v39  ;;  %v925_v51 = vmul.f32 %v3562_v8, %v923_v47  ;;  %v3757_v26 = vld [vmem:[%s4305_s3 + $0x30] sm:$0xff] }
  0x55   : > { %3029 = vmatpush3.msra.mxu0 %v331_v25  ;;  %v650_v49 = vadd.f32 %v648_v29, %v642_v38  ;;  %v933_v52 = vmul.f32 %v3570_v10, %v931_v48  ;;  %s3703_s9 = sld [smem:[#allocation5 + $0x3]]  ;;  %v939_v54 = vstv %s3666_s15  ;;  %v914_v56 = vmul.f32 %v913_v43, %v3549_v1 }
  0x56   : > { %3031 = vmatmul.mubr.msk.f32.vlgmr.msra.gmra.mxu0 %vm333_vm0, %v3684_v37  ;;  %v919_v53 = vadd.f32 %v917_v46, %v915_v45  ;;  %v947_v55 = vstv %s3669_s16  ;;  %s3710_s10 = sld [smem:[#allocation2 + $0x181]]  ;;  %v641_v59 = vadd.f32 %v639_v36, %v633_v50  ;;  %v655_v60 = vmul.f32 %v3610_v31, %v654_v19 }
  0x57   : > { %v658_v57 = vadd.f32 %v656_v33, %v650_v49  ;;  %3033 = vmatprep.mubr.msk.f32.mxu0 %vm333_vm0, %v3693_v44  ;;  %v663_v61 = vmul.f32 %v3625_v40, %v662_v21  ;;  %s3721_s14 = sld [smem:[#allocation2 + $0x182]]  ;;  %v941_v3 = vmul.f32 %v3575_v14, %v939_v54  ;;  %v955_v4 = vstv %s3673_s17 }
  0x58   : > { %v927_v63 = vadd.f32 %v925_v51, %v919_v53  ;;  %v918_v5 = vadd.f32 %v917_v46, %v914_v56  ;;  %s3730_s25 = sld [smem:[#allocation2 + $0x183]]  ;;  %v649_v11 = vadd.f32 %v647_v42, %v641_v59  ;;  %v949_v12 = vmul.f32 %v3593_v23, %v947_v55 }
  0x59   : > { %v666_v6 = vadd.f32 %v664_v34, %v658_v57  ;;  %v963_v13 = vstv %s3679_s23  ;;  %s3734_s26 = sld [smem:[#allocation2 + $0x184]]  ;;  %v971_v16 = vstv %s3688_s30  ;;  %v924_v17 = vmul.f32 %v3559_v7, %v923_v47  ;;  %v3779_v47 = vld [vmem:[%s4305_s3 + $0x38] sm:$0xff] }
  0x5a   : > { %3034 = vmatmul.mubr.msk.f32.gmra.mxu0 %vm333_vm0, %v3717_v58  ;;  %v935_v15 = vadd.f32 %v933_v52, %v927_v63  ;;  %v932_v19 = vmul.f32 %v3567_v9, %v931_v48  ;;  %s3741_s17 = sld [smem:[#allocation2 + $0x185]]  ;;  %v657_v21 = vadd.f32 %v655_v60, %v649_v11  ;;  %v957_v24 = vmul.f32 %v3603_v28, %v955_v4 }
  0x5b   : > { %3058 = vmatprep.subr.mxu0 %v666_v6  ;;  %3036 = vmatprep.mubr.msk.f32.mxu0 %vm333_vm0, %v3726_v62  ;;  %v1222_v25 = vstv %s3699_s8  ;;  %s3752_s23 = sld [smem:[#allocation2 + $0x186]]  ;;  %v965_v30 = vmul.f32 %v3613_v32, %v963_v13  ;;  %v926_v33 = vadd.f32 %v924_v17, %v918_v5  ;;  %v940_v34 = vmul.f32 %v3582_v18, %v939_v54 }
  0x5c   : > { %3059 = vmatpush3.msra.mxu0 %v666_v6  ;;  %v943_v29 = vadd.f32 %v941_v3, %v935_v15  ;;  %s3761_s13 = sld [smem:[#allocation2 + $0x187]]  ;;  %v665_v35 = vadd.f32 %v663_v61, %v657_v21  ;;  %v973_v36 = vmul.f32 %v3628_v41, %v971_v16  ;;  %v948_v38 = vmul.f32 %v3590_v22, %v947_v55 }
  0x5d   : > { %v1224_v39 = vmul.f32 %v1222_v25, %v3552_v2  ;;  %s3766_s8 = sld [smem:[#allocation2 + $0x200]]  ;;  %v934_v43 = vadd.f32 %v932_v19, %v926_v33  ;;  %v1226_v45 = vstv %s3703_s9  ;;  %v1232_v46 = vstv %s3710_s10 }
  0x5e   : > { %3037 = vmatmul.mubr.msk.f32.gmra.mxu0 %vm333_vm0, %v3748_v20  ;;  %v951_v42 = vadd.f32 %v949_v12, %v943_v29  ;;  %s3772_s15 = sld [smem:[#allocation5 + $0x4]]  ;;  %3060 = vmatprep.subr.mxu0 %v665_v35  ;;  %v1234_v49 = vmul.f32 %v3562_v8, %v1232_v46  ;;  %v1240_v50 = vstv %s3721_s14  ;;  %v1248_v51 = vstv %s3730_s25 }
  0x5f   : > { %3039 = vmatprep.mubr.msk.f32.mxu0 %vm333_vm0, %v3757_v26  ;;  %v1228_v48 = vadd.f32 %v1226_v45, %v1224_v39  ;;  %s3784_s9 = sld [smem:[#allocation2 + $0x201]]  ;;  %3061 = vmatpush3.msra.mxu0 %v665_v35  ;;  %v942_v53 = vadd.f32 %v940_v34, %v934_v43  ;;  %v956_v54 = vmul.f32 %v3600_v27, %v955_v4  ;;  %v1256_v60 = vstv %s3734_s26 }
  0x60   : > { %v959_v52 = vadd.f32 %v957_v24, %v951_v42  ;;  %v1242_v55 = vmul.f32 %v3570_v10, %v1240_v50  ;;  %s3788_s10 = sld [smem:[#allocation2 + $0x202]]  ;;  %v964_v56 = vmul.f32 %v3610_v31, %v963_v13  ;;  %v1250_v59 = vmul.f32 %v3575_v14, %v1248_v51 }
  0x61   : > { %v1236_v57 = vadd.f32 %v1234_v49, %v1228_v48  ;;  %s3793_s14 = sld [smem:[#allocation2 + $0x203]]  ;;  %v950_v63 = vadd.f32 %v948_v38, %v942_v53  ;;  %v1264_v3 = vstv %s3741_s17  ;;  %v1272_v4 = vstv %s3752_s23 }
  0x62   : > { %3040 = vmatmul.mubr.msk.f32.gmra.mxu0 %vm333_vm0, %v3779_v47  ;;  %v967_v61 = vadd.f32 %v965_v30, %v959_v52  ;;  %s3799_s25 = sld [smem:[#allocation2 + $0x204]]  ;;  %v1258_v6 = vmul.f32 %v3593_v23, %v1256_v60  ;;  %v1280_v11 = vstv %s3761_s13  ;;  %v1223_v12 = vmul.f32 %v1222_v25, %v3549_v1 }
  0x63   : > { %3062 = vmatprep.mubr.msk.f32.mxu0 %vm333_vm0, %v3536_v0  ;;  %v1244_v5 = vadd.f32 %v1242_v55, %v1236_v57  ;;  %s3806_s26 = sld [smem:[#allocation2 + $0x205]]  ;;  %v958_v15 = vadd.f32 %v956_v54, %v950_v63  ;;  %v972_v17 = vmul.f32 %v3625_v40, %v971_v16  ;;  %v1233_v19 = vmul.f32 %v3559_v7, %v1232_v46 }
  0x64   : > { %v975_v13 = vadd.f32 %v973_v36, %v967_v61  ;;  %s3810_s17 = sld [smem:[#allocation2 + $0x206]]  ;;  %v1266_v24 = vmul.f32 %v3603_v28, %v1264_v3  ;;  %v1227_v29 = vadd.f32 %v1226_v45, %v1223_v12  ;;  %v1241_v30 = vmul.f32 %v3567_v9, %v1240_v50 }
  0x65   : > { %v1252_v21 = vadd.f32 %v1250_v59, %v1244_v5  ;;  %s3814_s7 = sld [smem:[#allocation2 + $0x207]]  ;;  %v966_v25 = vadd.f32 %v964_v56, %v958_v15  ;;  %v1274_v16 = vmul.f32 %v3613_v32, %v1272_v4  ;;  %v1282_v33 = vmul.f32 %v3628_v41, %v1280_v11 }
  0x66   : > { %3063 = vmatmul.mubr.msk.f32.vlgmr.msra.gmra.mxu0 %vm333_vm0, %v3684_v37  ;;  %3090 = vmatprep.subr.mxu0 %v975_v13  ;;  %v1531_v34 = vstv %s3766_s8  ;;  %v1235_v36 = vadd.f32 %v1233_v19, %v1227_v29  ;;  %v1249_v38 = vmul.f32 %v3582_v18, %v1248_v51  ;;  %v1535_v39 = vstv %s3772_s15  ;;  %s3825_s23 = sld [smem:[#allocation2 + $0x280]] }
  0x67   : > { %3091 = vmatpush3.msra.mxu0 %v975_v13  ;;  %3065 = vmatprep.mubr.msk.f32.mxu0 %vm333_vm0, %v3693_v44  ;;  %v1260_v35 = vadd.f32 %v1258_v6, %v1252_v21  ;;  %v974_v42 = vadd.f32 %v972_v17, %v966_v25  ;;  %v1257_v43 = vmul.f32 %v3590_v22, %v1256_v60  ;;  %v1541_v46 = vstv %s3784_s9  ;;  %s3830_s30 = sld [smem:[#allocation5 + $0x5]] }
  0x68   : > { %v1533_v45 = vmul.f32 %v1531_v34, %v3552_v2  ;;  %v1243_v49 = vadd.f32 %v1241_v30, %v1235_v36  ;;  %v1543_v50 = vmul.f32 %v3562_v8, %v1541_v46  ;;  %v1549_v52 = vstv %s3788_s10  ;;  %s3834_s12 = sld [smem:[#allocation2 + $0x281]] }
  0x69   : > { %v1268_v48 = vadd.f32 %v1266_v24, %v1260_v35  ;;  %3092 = vmatprep.subr.mxu0 %v974_v42  ;;  %v1265_v51 = vmul.f32 %v3600_v27, %v1264_v3  ;;  %v1551_v54 = vmul.f32 %v3570_v10, %v1549_v52  ;;  %v1557_v55 = vstv %s3793_s14  ;;  %s3841_s13 = sld [smem:[#allocation2 + $0x282]] }
  0x6a   : > { %3066 = vmatmul.mubr.msk.f32.gmra.mxu0 %vm333_vm0, %v3717_v58  ;;  %v1537_v53 = vadd.f32 %v1535_v39, %v1533_v45  ;;  %v1251_v57 = vadd.f32 %v1249_v38, %v1243_v49  ;;  %v1273_v59 = vmul.f32 %v3610_v31, %v1272_v4  ;;  %v1565_v60 = vstv %s3799_s25  ;;  %s3847_s8 = sld [smem:[#allocation2 + $0x283]] }
  0x6b   : > { %3068 = vmatprep.mubr.msk.f32.mxu0 %vm333_vm0, %v3726_v62  ;;  %3093 = vmatpush3.msra.mxu0 %v974_v42  ;;  %v1276_v56 = vadd.f32 %v1274_v16, %v1268_v48  ;;  %v1559_v63 = vmul.f32 %v3575_v14, %v1557_v55  ;;  %v1573_v3 = vstv %s3806_s26  ;;  %v1581_v5 = vstv %s3810_s17  ;;  %s3852_s15 = sld [smem:[#allocation2 + $0x284]] }
  0x6c   : > { %v1545_v61 = vadd.f32 %v1543_v50, %v1537_v53  ;;  %v1259_v12 = vadd.f32 %v1257_v43, %v1251_v57  ;;  %v1281_v13 = vmul.f32 %v3625_v40, %v1280_v11  ;;  %v1589_v15 = vstv %s3814_s7  ;;  %s3856_s16 = sld [smem:[#allocation2 + $0x285]] }
  0x6d   : > { %v1284_v6 = vadd.f32 %v1282_v33, %v1276_v56  ;;  %v1567_v17 = vmul.f32 %v3593_v23, %v1565_v60  ;;  %v1532_v19 = vmul.f32 %v1531_v34, %v3549_v1  ;;  %v1542_v21 = vmul.f32 %v3559_v7, %v1541_v46  ;;  %s3874_s6 = sld [smem:[#allocation2 + $0x286]] }
  0x6e   : > { %3069 = vmatmul.mubr.msk.f32.gmra.mxu0 %vm333_vm0, %v3748_v20  ;;  %v1553_v4 = vadd.f32 %v1551_v54, %v1545_v61  ;;  %v1267_v24 = vadd.f32 %v1265_v51, %v1259_v12  ;;  %v1575_v11 = vmul.f32 %v3603_v28, %v1573_v3  ;;  %v1583_v29 = vmul.f32 %v3613_v32, %v1581_v5  ;;  %s3879_s9 = sld [smem:[#allocation2 + $0x287]] }
  0x6f   : > { %3071 = vmatprep.mubr.msk.f32.mxu0 %vm333_vm0, %v3757_v26  ;;  %3122 = vmatprep.subr.mxu0 %v1284_v6  ;;  %v1840_v30 = vstv %s3825_s23  ;;  %v1591_v16 = vmul.f32 %v3628_v41, %v1589_v15  ;;  %v1536_v33 = vadd.f32 %v1535_v39, %v1532_v19  ;;  %v1550_v34 = vmul.f32 %v3567_v9, %v1549_v52  ;;  %s3885_s10 = sld [smem:[#allocation2 + $0x300]] }
  0x70   : > { %v1561_v25 = vadd.f32 %v1559_v63, %v1553_v4  ;;  %v1275_v35 = vadd.f32 %v1273_v59, %v1267_v24  ;;  %v1558_v36 = vmul.f32 %v3582_v18, %v1557_v55  ;;  %v1566_v38 = vmul.f32 %v3590_v22, %v1565_v60  ;;  %s3891_s14 = sld [smem:[#allocation5 + $0x6]] }
  0x71   : > { %v1842_v42 = vmul.f32 %v1840_v30, %v3552_v2  ;;  %v1544_v39 = vadd.f32 %v1542_v21, %v1536_v33  ;;  %v1844_v45 = vstv %s3830_s30  ;;  %v1850_v46 = vstv %s3834_s12  ;;  %s3895_s25 = sld [smem:[#allocation2 + $0x301]] }
  0x72   : > { %3072 = vmatmul.mubr.msk.f32.gmra.mxu0 %vm333_vm0, %v3779_v47  ;;  %v1569_v43 = vadd.f32 %v1567_v17, %v1561_v25  ;;  %v1283_v48 = vadd.f32 %v1281_v13, %v1275_v35  ;;  %v1852_v50 = vmul.f32 %v3562_v8, %v1850_v46  ;;  %v1858_v52 = vstv %s3841_s13  ;;  %s3900_s26 = sld [smem:[#allocation2 + $0x302]] }
  0x73   : > { %3094 = vmatprep.mubr.msk.f32.mxu0 %vm333_vm0, %v3536_v0  ;;  %v1846_v49 = vadd.f32 %v1844_v45, %v1842_v42  ;;  %v1552_v53 = vadd.f32 %v1550_v34, %v1544_v39  ;;  %v1860_v54 = vmul.f32 %v3570_v10, %v1858_v52  ;;  %v1866_v55 = vstv %s3847_s8  ;;  %s3905_s23 = sld [smem:[#allocation2 + $0x303]] }
  0x74   : > { %v1577_v51 = vadd.f32 %v1575_v11, %v1569_v43  ;;  %v1868_v57 = vmul.f32 %v3575_v14, %v1866_v55  ;;  %v1874_v59 = vstv %s3852_s15  ;;  %v1882_v60 = vstv %s3856_s16  ;;  %s3911_s30 = sld [smem:[#allocation2 + $0x304]]  ;;  %s242_s16 = sand.u32 1, %s3404_s19  }
  0x75   : > { %v1854_v56 = vadd.f32 %v1852_v50, %v1846_v49  ;;  %v1560_v63 = vadd.f32 %v1558_v36, %v1552_v53  ;;  %v1574_v12 = vmul.f32 %v3600_v27, %v1573_v3  ;;  %v1876_v4 = vmul.f32 %v3593_v23, %v1874_v59  ;;  %s3919_s12 = sld [smem:[#allocation2 + $0x305]] }
  0x76   : > { %3095 = vmatmul.mubr.msk.f32.vlgmr.msra.gmra.mxu0 %vm333_vm0, %v3684_v37  ;;  %v1585_v61 = vadd.f32 %v1583_v29, %v1577_v51  ;;  %v1841_v17 = vmul.f32 %v1840_v30, %v3549_v1  ;;  %v1890_v21 = vstv %s3874_s6  ;;  %v1851_v29 = vmul.f32 %v3559_v7, %v1850_v46  ;;  %s3935_s13 = sld [smem:[#allocation2 + $0x306]]  ;;  %s3250_s6 = smul.u32 448, %s242_s16 }
  0x77   : > { %3123 = vmatpush3.msra.mxu0 %v1284_v6  ;;  %3097 = vmatprep.mubr.msk.f32.mxu0 %vm333_vm0, %v3693_v44  ;;  %v1862_v13 = vadd.f32 %v1860_v54, %v1854_v56  ;;  %v1568_v3 = vadd.f32 %v1566_v38, %v1560_v63  ;;  %v1884_v6 = vmul.f32 %v3603_v28, %v1882_v60  ;;  %v2149_v33 = vstv %s3885_s10  ;;  %s3943_s17 = sld [smem:[#allocation2 + $0x307]]  ;;  %v2146_v56 = vld [vmem:[%s3544_s11] sm:$0xff]  ;;  %s3251_s10 = smul.u32 7168, %s3470_s22 }
  0x78   : > { %3124 = vmatprep.subr.mxu0 %v1283_v48  ;;  %v3913_v19 = vadd.f32 %v1591_v16, %v1585_v61  ;;  %v1845_v11 = vadd.f32 %v1844_v45, %v1841_v17  ;;  %v1859_v25 = vmul.f32 %v3567_v9, %v1858_v52  ;;  %v1582_v1 = vmul.f32 %v3610_v31, %v1581_v5  ;;  %s4262_s22 = scalar_lea.sflag [#allocation3], %s242_s16 }
  0x79   : > { %3125 = vmatpush3.msra.mxu0 %v1283_v48  ;;  %v1870_v24 = vadd.f32 %v1868_v57, %v1862_v13  ;;  %v1590_v30 = vmul.f32 %v3625_v40, %v1589_v15  ;;  %v1898_v16 = vstv %s3879_s9  ;;  %v1576_v34 = vadd.f32 %v1574_v12, %v1568_v3  ;;  %s4137_s9 = scalar_lea.vmem [#allocation7], %s3250_s6 }
  0x7a   : > { %3098 = vmatmul.mubr.msk.f32.gmra.mxu0 %vm333_vm0, %v3717_v58  ;;  %3154 = vmatprep.subr.mxu0 %v3913_v19  ;;  %v1853_v36 = vadd.f32 %v1851_v29, %v1845_v11  ;;  %v1867_v38 = vmul.f32 %v3582_v18, %v1866_v55  ;;  %v1892_v42 = vmul.f32 %v3613_v32, %v1890_v21  ;;  %v2153_v43 = vstv %s3891_s14  ;;  %s2469_s14 = sshll.u32 %s4137_s9, 4  ;;  %s4254_s14 = int_to_ptr.vmem [resolvable:$true] %s2469_s14 }
  0x7b   : > { %3100 = vmatprep.mubr.msk.f32.mxu0 %vm333_vm0, %v3726_v62  ;;  %v1878_v35 = vadd.f32 %v1876_v4, %v1870_v24  ;;  %v1875_v5 = vmul.f32 %v3590_v22, %v1874_v59  ;;  %v2151_v15 = vmul.f32 %v2149_v33, %v3552_v2  ;;  %v2159_v46 = vstv %s3895_s25 }
  0x7c   : > { %v1861_v45 = vadd.f32 %v1859_v25, %v1853_v36  ;;  %v2167_v48 = vstv %s3900_s26  ;;  %v1883_v49 = vmul.f32 %v3600_v27, %v1882_v60  ;;  %v2161_v52 = vmul.f32 %v3562_v8, %v2159_v46 }
  0x7d   : > { %v1886_v39 = vadd.f32 %v1884_v6, %v1878_v35  ;;  %v2155_v50 = vadd.f32 %v2153_v43, %v2151_v15  ;;  %v2169_v2 = vmul.f32 %v3570_v10, %v2167_v48  ;;  %v1584_v51 = vadd.f32 %v1582_v1, %v1576_v34 }
  0x7e   : > { %3101 = vmatmul.mubr.msk.f32.gmra.mxu0 %vm333_vm0, %v3748_v20  ;;  %v1869_v53 = vadd.f32 %v1867_v38, %v1861_v45  ;;  %v2175_v54 = vstv %s3905_s23  ;;  %v2183_v55 = vstv %s3911_s30  ;;  %v1900_v57 = vmul.f32 %v3628_v41, %v1898_v16  ;;  %s4252_s23 = scalar_lea.hbm %s4307_s5, %s3251_s10  ;;  %s3344_s30 = scalar_lea.vmem %s4254_s14, 7168 }
  0x7f   : > { %3103 = vmatprep.mubr.msk.f32.mxu0 %vm333_vm0, %v3757_v26  ;;  %v2163_v59 = vadd.f32 %v2161_v52, %v2155_v50  ;;  %v2177_v60 = vmul.f32 %v3575_v14, %v2175_v54  ;;  %v1894_v61 = vadd.f32 %v1892_v42, %v1886_v39  ;;  %v1891_v8 = vmul.f32 %v3610_v31, %v1890_v21  ;;  %p3345_p10 = scmp.ne.s32.totalorder %s4254_s14, %s3344_s30 }
  0x80   : > { %v1877_v63 = vadd.f32 %v1875_v5, %v1869_v53  ;;  %v2191_v12 = vstv %s3919_s12  ;;  %v1899_v10 = vmul.f32 %v3625_v40, %v1898_v16  ;;  %v2185_v4 = vmul.f32 %v3593_v23, %v2183_v55  ;;  %s3416_s12 = smov [#allocation7]  }
  0x81   : > { %v2171_v13 = vadd.f32 %v2169_v2, %v2163_v59  ;;  %v2150_v17 = vmul.f32 %v2149_v33, %v2146_v56  ;;  %v1592_v3 = vadd.f32 %v1590_v30, %v1584_v51  ;;  %v2199_v6 = vstv %s3935_s13  ;;  %p3346_p0 = pnand %p3345_p10, %p4320_p12  ;;  %s3348_s13 = sshll.u32 %s3416_s12, 4  ;;  %s3349_s13 = int_to_ptr.vmem [resolvable:$false] %s3348_s13 }
  0x82   : > { %3104 = vmatmul.mubr.msk.f32.gmra.mxu0 %vm333_vm0, %v3779_v47  ;;  %v1885_v14 = vadd.f32 %v1883_v49, %v1877_v63  ;;  %v2160_v24 = vmul.f32 %v3559_v7, %v2159_v46  ;;  %v2193_v11 = vmul.f32 %v3603_v28, %v2191_v12  ;;  %v2168_v25 = vmul.f32 %v3567_v9, %v2167_v48  ;;  %p3351_p8 = scmp.lt.s32.totalorder %s4254_s14, %s3349_s13 }
  0x83   : > { %3126 = vmatprep.mubr.msk.f32.mxu0 %vm333_vm0, %v3536_v0  ;;  %v2179_v21 = vadd.f32 %v2177_v60, %v2171_v13  ;;  %v2154_v29 = vadd.f32 %v2153_v43, %v2150_v17  ;;  %v1902_v1 = vadd.f32 %v1900_v57, %v1894_v61  ;;  %v2207_v34 = vstv %s3943_s17  ;;  %p3347_p7 = pneg %p3346_p0  ;;  %s3350_s17 = scalar_lea.vmem %s3349_s13, 14336 }
  0x84   : > { %v1893_v16 = vadd.f32 %v1891_v8, %v1885_v14  ;;  %v2201_v33 = vmul.f32 %v3613_v32, %v2199_v6  ;;  %v2176_v35 = vmul.f32 %v3582_v18, %v2175_v54  ;;  %v2209_v28 = vmul.f32 %v3628_v41, %v2207_v34  ;;  %p3352_p11 = scmp.lt.s32.totalorder %s3350_s17, %s3344_s30 }
  0x85   : > { %v2187_v23 = vadd.f32 %v2185_v4, %v2179_v21  ;;  %v2162_v30 = vadd.f32 %v2160_v24, %v2154_v29  ;;  %v2184_v38 = vmul.f32 %v3590_v22, %v2183_v55  ;;  %v2200_v15 = vmul.f32 %v3610_v31, %v2199_v6  ;;  %v3997_v31 = vld [vmem:[%s4306_s4 + $0x8] sm:$0xff] }
  0x86   : > { %3127 = vmatmul.mubr.msk.f32.vlgmr.msra.gmra.mxu0 %vm333_vm0, %v3684_v37  ;;  %v1901_v7 = vadd.f32 %v1899_v10, %v1893_v16  ;;  %v2208_v41 = vmul.f32 %v3625_v40, %v2207_v34  ;;  %3042 = vmatprep.subr.mxu1 %v3997_v31  ;;  %v4007_v40 = vld [vmem:[%s4306_s4] sm:$0xff]  ;;  %p3353_p13 = por %p3352_p11, %p3351_p8 }
  0x87   : > { %3155 = vmatpush3.msra.mxu0 %v3913_v19  ;;  %3129 = vmatprep.mubr.msk.f32.mxu0 %vm333_vm0, %v3693_v44  ;;  %v2195_v9 = vadd.f32 %v2193_v11, %v2187_v23  ;;  %v2170_v36 = vadd.f32 %v2168_v25, %v2162_v30  ;;  %v2192_v19 = vmul.f32 %v3600_v27, %v2191_v12 }
  0x88   : > { %3156 = vmatprep.subr.mxu0 %v1592_v3  ;;  %3043 = vmatpush3.msra.mxu1 %v3997_v31  ;;  %p3354_p1 = pnand %p3353_p13, %p3347_p7 }
  0x89   : > { %3157 = vmatpush3.msra.mxu0 %v1592_v3  ;;  %v2203_v32 = vadd.f32 %v2201_v33, %v2195_v9  ;;  %v2178_v18 = vadd.f32 %v2176_v35, %v2170_v36  ;;  %3044 = vmatprep.subr.mxu1 %v4007_v40 }
  0x8a   : > { %3130 = vmatmul.mubr.msk.f32.gmra.mxu0 %vm333_vm0, %v3717_v58  ;;  %3186 = vmatprep.subr.mxu0 %v1902_v1 }
  0x8b   : > { %3132 = vmatprep.mubr.msk.f32.mxu0 %vm333_vm0, %v3726_v62  ;;  %v2211_v42 = vadd.f32 %v2209_v28, %v2203_v32  ;;  %v2186_v5 = vadd.f32 %v2184_v38, %v2178_v18  ;;  %3045 = vmatpush3.msra.mxu1 %v4007_v40 }
  0x8c   : > { %3074 = vmatprep.subr.mxu1 %v3997_v31 }
  0x8d   : > { %v2194_v22 = vadd.f32 %v2192_v19, %v2186_v5 }
  0x8e   : > { %3133 = vmatmul.mubr.msk.f32.gmra.mxu0 %vm333_vm0, %v3748_v20 }
  0x8f   : > { %3135 = vmatprep.mubr.msk.f32.mxu0 %vm333_vm0, %v3757_v26  ;;  %v2202_v43 = vadd.f32 %v2200_v15, %v2194_v22 }
  0x91   : > { %v2210_v27 = vadd.f32 %v2208_v41, %v2202_v43 }
  0x92   : > { %3136 = vmatmul.mubr.msk.f32.gmra.mxu0 %vm333_vm0, %v3779_v47 }
  0x93   : > { %3158 = vmatprep.mubr.msk.f32.mxu0 %vm333_vm0, %v3536_v0 }
  0x96   : > { %3159 = vmatmul.mubr.msk.f32.vlgmr.msra.gmra.mxu0 %vm333_vm0, %v3684_v37 }
  0x97   : > { %3187 = vmatpush3.msra.mxu0 %v1902_v1  ;;  %3161 = vmatprep.mubr.msk.f32.mxu0 %vm333_vm0, %v3693_v44 }
  0x98   : > { %3188 = vmatprep.subr.mxu0 %v1901_v7 }
  0x99   : > { %3189 = vmatpush3.msra.mxu0 %v1901_v7 }
  0x9a   : > { %3162 = vmatmul.mubr.msk.f32.gmra.mxu0 %vm333_vm0, %v3717_v58  ;;  %3218 = vmatprep.subr.mxu0 %v2211_v42 }
  0x9b   : > { %3164 = vmatprep.mubr.msk.f32.mxu0 %vm333_vm0, %v3726_v62 }
  0x9e   : > { %3165 = vmatmul.mubr.msk.f32.gmra.mxu0 %vm333_vm0, %v3748_v20 }
  0x9f   : > { %3167 = vmatprep.mubr.msk.f32.mxu0 %vm333_vm0, %v3757_v26 }
  0xa2   : > { %3168 = vmatmul.mubr.msk.f32.gmra.mxu0 %vm333_vm0, %v3779_v47 }
  0xa3   : > { %3190 = vmatprep.mubr.msk.f32.mxu0 %vm333_vm0, %v3536_v0 }
  0xa6   : > { %3191 = vmatmul.mubr.msk.f32.vlgmr.msra.gmra.mxu0 %vm333_vm0, %v3684_v37 }
  0xa7   : > { %3219 = vmatpush3.msra.mxu0 %v2211_v42  ;;  %3193 = vmatprep.mubr.msk.f32.mxu0 %vm333_vm0, %v3693_v44 }
  0xa8   : > { %3220 = vmatprep.subr.mxu0 %v2210_v27 }
  0xa9   : > { %3221 = vmatpush3.msra.mxu0 %v2210_v27 }
  0xaa   : > { %3194 = vmatmul.mubr.msk.f32.gmra.mxu0 %vm333_vm0, %v3717_v58 }
  0xab   : > { %3196 = vmatprep.mubr.msk.f32.mxu0 %vm333_vm0, %v3726_v62 }
  0xae   : > { %3197 = vmatmul.mubr.msk.f32.gmra.mxu0 %vm333_vm0, %v3748_v20 }
  0xaf   : > { %3199 = vmatprep.mubr.msk.f32.mxu0 %vm333_vm0, %v3757_v26 }
  0xb2   : > { %3200 = vmatmul.mubr.msk.f32.gmra.mxu0 %vm333_vm0, %v3779_v47 }
  0xb3   : > { %3222 = vmatprep.mubr.msk.f32.mxu0 %vm333_vm0, %v3536_v0 }
  0xb6   : > { %3223 = vmatmul.mubr.msk.f32.vlgmr.msra.gmra.mxu0 %vm333_vm0, %v3684_v37 }
  0xb7   : > { %3225 = vmatprep.mubr.msk.f32.mxu0 %vm333_vm0, %v3693_v44 }
  0xba   : > { %3226 = vmatmul.mubr.msk.f32.gmra.mxu0 %vm333_vm0, %v3717_v58 }
  0xbb   : > { %3228 = vmatprep.mubr.msk.f32.mxu0 %vm333_vm0, %v3726_v62 }
  0xbe   : > { %3229 = vmatmul.mubr.msk.f32.gmra.mxu0 %vm333_vm0, %v3748_v20 }
  0xbf   : > { %3231 = vmatprep.mubr.msk.f32.mxu0 %vm333_vm0, %v3757_v26 }
  0xc2   : > { %3232 = vmatmul.mubr.msk.f32.gmra.mxu0 %vm333_vm0, %v3779_v47 }
 0x116   : > { %v3032_v0 = vpop.f32.mrf.mxu0 }
 0x118   : > { %v424_v37 = vpop.f32.mrf.mxu0 }
 0x119   : > { %3046 = vmatprep.mubr.msk.f32.mxu1 %vm333_vm0, %v424_v37 }
 0x11a   : > { %v3035_v44 = vpop.f32.mrf.mxu0  ;;  %3047 = vmatmul.mubr.msk.f32.vlgmr.msra.gmra.mxu1 %vm333_vm0, %v3032_v0 }
 0x11b   : > { %3075 = vmatpush3.msra.mxu1 %v3997_v31 }
 0x11c   : > { %v434_v58 = vpop.f32.mrf.mxu0  ;;  %3076 = vmatprep.subr.mxu1 %v4007_v40 }
 0x11d   : > { %3049 = vmatprep.mubr.msk.f32.mxu1 %vm333_vm0, %v434_v58  ;;  %3077 = vmatpush3.msra.mxu1 %v4007_v40 }
 0x11e   : > { %v3038_v62 = vpop.f32.mrf.mxu0  ;;  %3050 = vmatmul.mubr.msk.f32.gmra.mxu1 %vm333_vm0, %v3035_v44  ;;  %3106 = vmatprep.subr.mxu1 %v3997_v31 }
 0x120   : > { %v444_v20 = vpop.f32.mrf.mxu0 }
 0x121   : > { %3052 = vmatprep.mubr.msk.f32.mxu1 %vm333_vm0, %v444_v20 }
 0x122   : > { %v3041_v26 = vpop.f32.mrf.mxu0  ;;  %3053 = vmatmul.mubr.msk.f32.gmra.mxu1 %vm333_vm0, %v3038_v62 }
 0x124   : > { %v454_v47 = vpop.f32.mrf.mxu0 }
 0x125   : > { %3055 = vmatprep.mubr.msk.f32.mxu1 %vm333_vm0, %v454_v47 }
 0x126   : > { %3056 = vmatmul.mubr.msk.f32.gmra.mxu1 %vm333_vm0, %v3041_v26  ;;  %v3064_v39 = vpop.f32.mrf.mxu0 }
 0x128   : > { %v733_v45 = vpop.f32.mrf.mxu0 }
 0x129   : > { %3078 = vmatprep.mubr.msk.f32.mxu1 %vm333_vm0, %v733_v45 }
 0x12a   : > { %v3067_v46 = vpop.f32.mrf.mxu0  ;;  %3079 = vmatmul.mubr.msk.f32.vlgmr.msra.gmra.mxu1 %vm333_vm0, %v3064_v39 }
 0x12b   : > { %3107 = vmatpush3.msra.mxu1 %v3997_v31 }
 0x12c   : > { %v743_v48 = vpop.f32.mrf.mxu0  ;;  %3108 = vmatprep.subr.mxu1 %v4007_v40 }
 0x12d   : > { %3081 = vmatprep.mubr.msk.f32.mxu1 %vm333_vm0, %v743_v48  ;;  %3109 = vmatpush3.msra.mxu1 %v4007_v40 }
 0x12e   : > { %v3070_v49 = vpop.f32.mrf.mxu0  ;;  %3082 = vmatmul.mubr.msk.f32.gmra.mxu1 %vm333_vm0, %v3067_v46  ;;  %3138 = vmatprep.subr.mxu1 %v3997_v31 }
 0x130   : > { %v753_v50 = vpop.f32.mrf.mxu0 }
 0x131   : > { %3084 = vmatprep.mubr.msk.f32.mxu1 %vm333_vm0, %v753_v50 }
 0x132   : > { %v3073_v52 = vpop.f32.mrf.mxu0  ;;  %3085 = vmatmul.mubr.msk.f32.gmra.mxu1 %vm333_vm0, %v3070_v49 }
 0x134   : > { %v763_v2 = vpop.f32.mrf.mxu0 }
 0x135   : > { %3087 = vmatprep.mubr.msk.f32.mxu1 %vm333_vm0, %v763_v2 }
 0x136   : > { %3088 = vmatmul.mubr.msk.f32.gmra.mxu1 %vm333_vm0, %v3073_v52  ;;  %v3096_v51 = vpop.f32.mrf.mxu0 }
 0x138   : > { %v1042_v53 = vpop.f32.mrf.mxu0 }
 0x139   : > { %3110 = vmatprep.mubr.msk.f32.mxu1 %vm333_vm0, %v1042_v53 }
 0x13a   : > { %v3099_v54 = vpop.f32.mrf.mxu0  ;;  %3111 = vmatmul.mubr.msk.f32.vlgmr.msra.gmra.mxu1 %vm333_vm0, %v3096_v51 }
 0x13b   : > { %3139 = vmatpush3.msra.mxu1 %v3997_v31 }
 0x13c   : > { %v1052_v55 = vpop.f32.mrf.mxu0  ;;  %3140 = vmatprep.subr.mxu1 %v4007_v40 }
 0x13d   : > { %3113 = vmatprep.mubr.msk.f32.mxu1 %vm333_vm0, %v1052_v55  ;;  %3141 = vmatpush3.msra.mxu1 %v4007_v40 }
 0x13e   : > { %v3102_v56 = vpop.f32.mrf.mxu0  ;;  %3114 = vmatmul.mubr.msk.f32.gmra.mxu1 %vm333_vm0, %v3099_v54  ;;  %3170 = vmatprep.subr.mxu1 %v3997_v31 }
 0x140   : > { %v1062_v57 = vpop.f32.mrf.mxu0 }
 0x141   : > { %3116 = vmatprep.mubr.msk.f32.mxu1 %vm333_vm0, %v1062_v57 }
 0x142   : > { %v3105_v59 = vpop.f32.mrf.mxu0  ;;  %3117 = vmatmul.mubr.msk.f32.gmra.mxu1 %vm333_vm0, %v3102_v56 }
 0x144   : > { %v1072_v60 = vpop.f32.mrf.mxu0 }
 0x145   : > { %3119 = vmatprep.mubr.msk.f32.mxu1 %vm333_vm0, %v1072_v60 }
 0x146   : > { %3120 = vmatmul.mubr.msk.f32.gmra.mxu1 %vm333_vm0, %v3105_v59  ;;  %v3128_v61 = vpop.f32.mrf.mxu0 }
 0x148   : > { %v1351_v63 = vpop.f32.mrf.mxu0 }
 0x149   : > { %3142 = vmatprep.mubr.msk.f32.mxu1 %vm333_vm0, %v1351_v63 }
 0x14a   : > { %v3131_v8 = vpop.f32.mrf.mxu0  ;;  %3143 = vmatmul.mubr.msk.f32.vlgmr.msra.gmra.mxu1 %vm333_vm0, %v3128_v61 }
 0x14b   : > { %3171 = vmatpush3.msra.mxu1 %v3997_v31 }
 0x14c   : > { %v1361_v12 = vpop.f32.mrf.mxu0  ;;  %3172 = vmatprep.subr.mxu1 %v4007_v40 }
 0x14d   : > { %3145 = vmatprep.mubr.msk.f32.mxu1 %vm333_vm0, %v1361_v12  ;;  %3173 = vmatpush3.msra.mxu1 %v4007_v40 }
 0x14e   : > { %v3134_v10 = vpop.f32.mrf.mxu0  ;;  %3146 = vmatmul.mubr.msk.f32.gmra.mxu1 %vm333_vm0, %v3131_v8  ;;  %3202 = vmatprep.subr.mxu1 %v3997_v31 }
 0x150   : > { %v1371_v13 = vpop.f32.mrf.mxu0 }
 0x151   : > { %3148 = vmatprep.mubr.msk.f32.mxu1 %vm333_vm0, %v1371_v13 }
 0x152   : > { %v3137_v4 = vpop.f32.mrf.mxu0  ;;  %3149 = vmatmul.mubr.msk.f32.gmra.mxu1 %vm333_vm0, %v3134_v10 }
 0x154   : > { %v1381_v17 = vpop.f32.mrf.mxu0 }
 0x155   : > { %3151 = vmatprep.mubr.msk.f32.mxu1 %vm333_vm0, %v1381_v17 }
 0x156   : > { %3152 = vmatmul.mubr.msk.f32.gmra.mxu1 %vm333_vm0, %v3137_v4  ;;  %v3160_v3 = vpop.f32.mrf.mxu0 }
 0x158   : > { %v1660_v14 = vpop.f32.mrf.mxu0 }
 0x159   : > { %3174 = vmatprep.mubr.msk.f32.mxu1 %vm333_vm0, %v1660_v14 }
 0x15a   : > { %v3163_v6 = vpop.f32.mrf.mxu0  ;;  %3175 = vmatmul.mubr.msk.f32.vlgmr.msra.gmra.mxu1 %vm333_vm0, %v3160_v3 }
 0x15b   : > { %3203 = vmatpush3.msra.mxu1 %v3997_v31 }
 0x15c   : > { %v1670_v24 = vpop.f32.mrf.mxu0  ;;  %3204 = vmatprep.subr.mxu1 %v4007_v40 }
 0x15d   : > { %3177 = vmatprep.mubr.msk.f32.mxu1 %vm333_vm0, %v1670_v24  ;;  %3205 = vmatpush3.msra.mxu1 %v4007_v40 }
 0x15e   : > { %v3166_v21 = vpop.f32.mrf.mxu0  ;;  %3178 = vmatmul.mubr.msk.f32.gmra.mxu1 %vm333_vm0, %v3163_v6  ;;  %3234 = vmatprep.subr.mxu1 %v3997_v31 }
 0x160   : > { %v1680_v11 = vpop.f32.mrf.mxu0 }
 0x161   : > { %3180 = vmatprep.mubr.msk.f32.mxu1 %vm333_vm0, %v1680_v11 }
 0x162   : > { %v3169_v29 = vpop.f32.mrf.mxu0  ;;  %3181 = vmatmul.mubr.msk.f32.gmra.mxu1 %vm333_vm0, %v3166_v21 }
 0x164   : > { %v1690_v25 = vpop.f32.mrf.mxu0 }
 0x165   : > { %3183 = vmatprep.mubr.msk.f32.mxu1 %vm333_vm0, %v1690_v25 }
 0x166   : > { %3184 = vmatmul.mubr.msk.f32.gmra.mxu1 %vm333_vm0, %v3169_v29  ;;  %v3192_v1 = vpop.f32.mrf.mxu0 }
 0x168   : > { %v1969_v16 = vpop.f32.mrf.mxu0 }
 0x169   : > { %3206 = vmatprep.mubr.msk.f32.mxu1 %vm333_vm0, %v1969_v16 }
 0x16a   : > { %v3195_v34 = vpop.f32.mrf.mxu0  ;;  %3207 = vmatmul.mubr.msk.f32.vlgmr.msra.gmra.mxu1 %vm333_vm0, %v3192_v1 }
 0x16b   : > { %3235 = vmatpush3.msra.mxu1 %v3997_v31 }
 0x16c   : > { %v1979_v23 = vpop.f32.mrf.mxu0  ;;  %3236 = vmatprep.subr.mxu1 %v4007_v40 }
 0x16d   : > { %3209 = vmatprep.mubr.msk.f32.mxu1 %vm333_vm0, %v1979_v23  ;;  %3237 = vmatpush3.msra.mxu1 %v4007_v40 }
 0x16e   : > { %v3198_v33 = vpop.f32.mrf.mxu0  ;;  %3210 = vmatmul.mubr.msk.f32.gmra.mxu1 %vm333_vm0, %v3195_v34 }
 0x170   : > { %v1989_v30 = vpop.f32.mrf.mxu0 }
 0x171   : > { %3212 = vmatprep.mubr.msk.f32.mxu1 %vm333_vm0, %v1989_v30 }
 0x172   : > { %v3201_v35 = vpop.f32.mrf.mxu0  ;;  %3213 = vmatmul.mubr.msk.f32.gmra.mxu1 %vm333_vm0, %v3198_v33 }
 0x174   : > { %v1999_v7 = vpop.f32.mrf.mxu0 }
 0x175   : > { %3215 = vmatprep.mubr.msk.f32.mxu1 %vm333_vm0, %v1999_v7 }
 0x176   : > { %3216 = vmatmul.mubr.msk.f32.gmra.mxu1 %vm333_vm0, %v3201_v35  ;;  %v3224_v9 = vpop.f32.mrf.mxu0 }
 0x178   : > { %v2278_v28 = vpop.f32.mrf.mxu0 }
 0x179   : > { %3238 = vmatprep.mubr.msk.f32.mxu1 %vm333_vm0, %v2278_v28 }
 0x17a   : > { %v3227_v36 = vpop.f32.mrf.mxu0  ;;  %3239 = vmatmul.mubr.msk.f32.vlgmr.msra.gmra.mxu1 %vm333_vm0, %v3224_v9 }
 0x17c   : > { %v2288_v38 = vpop.f32.mrf.mxu0 }
 0x17d   : > { %3241 = vmatprep.mubr.msk.f32.mxu1 %vm333_vm0, %v2288_v38 }
 0x17e   : > { %v3230_v32 = vpop.f32.mrf.mxu0  ;;  %3242 = vmatmul.mubr.msk.f32.gmra.mxu1 %vm333_vm0, %v3227_v36 }
 0x180   : > { %v2298_v18 = vpop.f32.mrf.mxu0 }
 0x181   : > { %3244 = vmatprep.mubr.msk.f32.mxu1 %vm333_vm0, %v2298_v18 }
 0x182   : > { %v3233_v19 = vpop.f32.mrf.mxu0  ;;  %3245 = vmatmul.mubr.msk.f32.gmra.mxu1 %vm333_vm0, %v3230_v32 }
 0x184   : > { %v2308_v42 = vpop.f32.mrf.mxu0 }
 0x185   : > { %3247 = vmatprep.mubr.msk.f32.mxu1 %vm333_vm0, %v2308_v42 }
 0x186   : > { %3248 = vmatmul.mubr.msk.f32.gmra.mxu1 %vm333_vm0, %v3233_v19 }
 0x1da   : > { %v3048_v5 = vpop.f32.mrf.mxu1 }
 0x1db   : > { %594 = vst.msk [vmem:[%s4137_s9 + $0x8] sm:$0xff] %vm592_vm1, %v3048_v5 }
 0x1dc   : > { %v553_v15 = vpop.f32.mrf.mxu1 }
 0x1dd   : > { %593 = vst.msk [vmem:[%s4137_s9] sm:$0xff] %vm592_vm1, %v553_v15 }
 0x1de   : > { %v3051_v22 = vpop.f32.mrf.mxu1 }
 0x1df   : > { %596 = vst.msk [vmem:[%s4137_s9 + $0x18] sm:$0xff] %vm592_vm1, %v3051_v22 }
 0x1e0   : > { %v563_v41 = vpop.f32.mrf.mxu1 }
 0x1e1   : > { %595 = vst.msk [vmem:[%s4137_s9 + $0x10] sm:$0xff] %vm592_vm1, %v563_v41 }
 0x1e2   : > { %v3054_v43 = vpop.f32.mrf.mxu1 }
 0x1e3   : > { %598 = vst.msk [vmem:[%s4137_s9 + $0x28] sm:$0xff] %vm592_vm1, %v3054_v43 }
 0x1e4   : > { %v573_v27 = vpop.f32.mrf.mxu1 }
 0x1e5   : > { %597 = vst.msk [vmem:[%s4137_s9 + $0x20] sm:$0xff] %vm592_vm1, %v573_v27 }
 0x1e6   : > { %v3057_v31 = vpop.f32.mrf.mxu1 }
 0x1e7   : > { %600 = vst.msk [vmem:[%s4137_s9 + $0x38] sm:$0xff] %vm592_vm1, %v3057_v31 }
 0x1e8   : > { %v583_v40 = vpop.f32.mrf.mxu1 }
 0x1e9   : > { %599 = vst.msk [vmem:[%s4137_s9 + $0x30] sm:$0xff] %vm592_vm1, %v583_v40 }
 0x1ea   : > { %v3080_v0 = vpop.f32.mrf.mxu1 }
 0x1eb   : > { %2640 = vst.msk [vmem:[%s4137_s9 + $0x48] sm:$0xff] %vm592_vm1, %v3080_v0 }
 0x1ec   : > { %v862_v37 = vpop.f32.mrf.mxu1 }
 0x1ed   : > { %2639 = vst.msk [vmem:[%s4137_s9 + $0x40] sm:$0xff] %vm592_vm1, %v862_v37 }
 0x1ee   : > { %v3083_v44 = vpop.f32.mrf.mxu1 }
 0x1ef   : > { %2642 = vst.msk [vmem:[%s4137_s9 + $0x58] sm:$0xff] %vm592_vm1, %v3083_v44 }
 0x1f0   : > { %v872_v58 = vpop.f32.mrf.mxu1 }
 0x1f1   : > { %2641 = vst.msk [vmem:[%s4137_s9 + $0x50] sm:$0xff] %vm592_vm1, %v872_v58 }
 0x1f2   : > { %v3086_v62 = vpop.f32.mrf.mxu1 }
 0x1f3   : > { %2644 = vst.msk [vmem:[%s4137_s9 + $0x68] sm:$0xff] %vm592_vm1, %v3086_v62 }
 0x1f4   : > { %v882_v20 = vpop.f32.mrf.mxu1 }
 0x1f5   : > { %2643 = vst.msk [vmem:[%s4137_s9 + $0x60] sm:$0xff] %vm592_vm1, %v882_v20 }
 0x1f6   : > { %v3089_v26 = vpop.f32.mrf.mxu1 }
 0x1f7   : > { %2646 = vst.msk [vmem:[%s4137_s9 + $0x78] sm:$0xff] %vm592_vm1, %v3089_v26 }
 0x1f8   : > { %v892_v47 = vpop.f32.mrf.mxu1 }
 0x1f9   : > { %2645 = vst.msk [vmem:[%s4137_s9 + $0x70] sm:$0xff] %vm592_vm1, %v892_v47 }
 0x1fa   : > { %v3112_v39 = vpop.f32.mrf.mxu1 }
 0x1fb   : > { %2687 = vst.msk [vmem:[%s4137_s9 + $0x88] sm:$0xff] %vm592_vm1, %v3112_v39 }
 0x1fc   : > { %v1171_v45 = vpop.f32.mrf.mxu1 }
 0x1fd   : > { %2686 = vst.msk [vmem:[%s4137_s9 + $0x80] sm:$0xff] %vm592_vm1, %v1171_v45 }
 0x1fe   : > { %v3115_v46 = vpop.f32.mrf.mxu1 }
 0x1ff   : > { %2689 = vst.msk [vmem:[%s4137_s9 + $0x98] sm:$0xff] %vm592_vm1, %v3115_v46 }
 0x200   : > { %v1181_v48 = vpop.f32.mrf.mxu1 }
 0x201   : > { %2688 = vst.msk [vmem:[%s4137_s9 + $0x90] sm:$0xff] %vm592_vm1, %v1181_v48 }
 0x202   : > { %v3118_v49 = vpop.f32.mrf.mxu1 }
 0x203   : > { %2691 = vst.msk [vmem:[%s4137_s9 + $0xa8] sm:$0xff] %vm592_vm1, %v3118_v49 }
 0x204   : > { %v1191_v50 = vpop.f32.mrf.mxu1 }
 0x205   : > { %2690 = vst.msk [vmem:[%s4137_s9 + $0xa0] sm:$0xff] %vm592_vm1, %v1191_v50 }
 0x206   : > { %v3121_v52 = vpop.f32.mrf.mxu1 }
 0x207   : > { %2693 = vst.msk [vmem:[%s4137_s9 + $0xb8] sm:$0xff] %vm592_vm1, %v3121_v52 }
 0x208   : > { %v1201_v2 = vpop.f32.mrf.mxu1 }
 0x209   : > { %2692 = vst.msk [vmem:[%s4137_s9 + $0xb0] sm:$0xff] %vm592_vm1, %v1201_v2 }
 0x20a   : > { %v3144_v51 = vpop.f32.mrf.mxu1 }
 0x20b   : > { %2734 = vst.msk [vmem:[%s4137_s9 + $0xc8] sm:$0xff] %vm592_vm1, %v3144_v51 }
 0x20c   : > { %v1480_v53 = vpop.f32.mrf.mxu1 }
 0x20d   : > { %2733 = vst.msk [vmem:[%s4137_s9 + $0xc0] sm:$0xff] %vm592_vm1, %v1480_v53 }
 0x20e   : > { %v3147_v54 = vpop.f32.mrf.mxu1 }
 0x20f   : > { %2736 = vst.msk [vmem:[%s4137_s9 + $0xd8] sm:$0xff] %vm592_vm1, %v3147_v54 }
 0x210   : > { %v1490_v55 = vpop.f32.mrf.mxu1 }
 0x211   : > { %2735 = vst.msk [vmem:[%s4137_s9 + $0xd0] sm:$0xff] %vm592_vm1, %v1490_v55 }
 0x212   : > { %v3150_v56 = vpop.f32.mrf.mxu1 }
 0x213   : > { %2738 = vst.msk [vmem:[%s4137_s9 + $0xe8] sm:$0xff] %vm592_vm1, %v3150_v56 }
 0x214   : > { %v1500_v57 = vpop.f32.mrf.mxu1 }
 0x215   : > { %2737 = vst.msk [vmem:[%s4137_s9 + $0xe0] sm:$0xff] %vm592_vm1, %v1500_v57 }
 0x216   : > { %v3153_v59 = vpop.f32.mrf.mxu1 }
 0x217   : > { %2740 = vst.msk [vmem:[%s4137_s9 + $0xf8] sm:$0xff] %vm592_vm1, %v3153_v59 }
 0x218   : > { %v1510_v60 = vpop.f32.mrf.mxu1 }
 0x219   : > { %2739 = vst.msk [vmem:[%s4137_s9 + $0xf0] sm:$0xff] %vm592_vm1, %v1510_v60 }
 0x21a   : > { %v3176_v61 = vpop.f32.mrf.mxu1 }
 0x21b   : > { %2781 = vst.msk [vmem:[%s4137_s9 + $0x108] sm:$0xff] %vm592_vm1, %v3176_v61 }
 0x21c   : > { %v1789_v63 = vpop.f32.mrf.mxu1 }
 0x21d   : > { %2780 = vst.msk [vmem:[%s4137_s9 + $0x100] sm:$0xff] %vm592_vm1, %v1789_v63 }
 0x21e   : > { %v3179_v8 = vpop.f32.mrf.mxu1 }
 0x21f   : > { %2783 = vst.msk [vmem:[%s4137_s9 + $0x118] sm:$0xff] %vm592_vm1, %v3179_v8 }
 0x220   : > { %v1799_v12 = vpop.f32.mrf.mxu1 }
 0x221   : > { %2782 = vst.msk [vmem:[%s4137_s9 + $0x110] sm:$0xff] %vm592_vm1, %v1799_v12 }
 0x222   : > { %v3182_v10 = vpop.f32.mrf.mxu1 }
 0x223   : > { %2785 = vst.msk [vmem:[%s4137_s9 + $0x128] sm:$0xff] %vm592_vm1, %v3182_v10 }
 0x224   : > { %v1809_v13 = vpop.f32.mrf.mxu1 }
 0x225   : > { %2784 = vst.msk [vmem:[%s4137_s9 + $0x120] sm:$0xff] %vm592_vm1, %v1809_v13 }
 0x226   : > { %v3185_v4 = vpop.f32.mrf.mxu1 }
 0x227   : > { %2787 = vst.msk [vmem:[%s4137_s9 + $0x138] sm:$0xff] %vm592_vm1, %v3185_v4 }
 0x228   : > { %v1819_v17 = vpop.f32.mrf.mxu1 }
 0x229   : > { %2786 = vst.msk [vmem:[%s4137_s9 + $0x130] sm:$0xff] %vm592_vm1, %v1819_v17 }
 0x22a   : > { %v3208_v3 = vpop.f32.mrf.mxu1 }
 0x22b   : > { %2828 = vst.msk [vmem:[%s4137_s9 + $0x148] sm:$0xff] %vm592_vm1, %v3208_v3 }
 0x22c   : > { %v2098_v14 = vpop.f32.mrf.mxu1 }
 0x22d   : > { %2827 = vst.msk [vmem:[%s4137_s9 + $0x140] sm:$0xff] %vm592_vm1, %v2098_v14 }
 0x22e   : > { %v3211_v6 = vpop.f32.mrf.mxu1 }
 0x22f   : > { %2830 = vst.msk [vmem:[%s4137_s9 + $0x158] sm:$0xff] %vm592_vm1, %v3211_v6 }
 0x230   : > { %v2108_v24 = vpop.f32.mrf.mxu1 }
 0x231   : > { %2829 = vst.msk [vmem:[%s4137_s9 + $0x150] sm:$0xff] %vm592_vm1, %v2108_v24 }
 0x232   : > { %v3214_v21 = vpop.f32.mrf.mxu1 }
 0x233   : > { %2832 = vst.msk [vmem:[%s4137_s9 + $0x168] sm:$0xff] %vm592_vm1, %v3214_v21 }
 0x234   : > { %v2118_v11 = vpop.f32.mrf.mxu1 }
 0x235   : > { %2831 = vst.msk [vmem:[%s4137_s9 + $0x160] sm:$0xff] %vm592_vm1, %v2118_v11 }
 0x236   : > { %v3217_v29 = vpop.f32.mrf.mxu1 }
 0x237   : > { %2834 = vst.msk [vmem:[%s4137_s9 + $0x178] sm:$0xff] %vm592_vm1, %v3217_v29 }
 0x238   : > { %v2128_v25 = vpop.f32.mrf.mxu1 }
 0x239   : > { %2833 = vst.msk [vmem:[%s4137_s9 + $0x170] sm:$0xff] %vm592_vm1, %v2128_v25 }
 0x23a   : > { %v3240_v1 = vpop.f32.mrf.mxu1 }
 0x23b   : > { %2875 = vst.msk [vmem:[%s4137_s9 + $0x188] sm:$0xff] %vm592_vm1, %v3240_v1 }
 0x23c   : > { %v2407_v16 = vpop.f32.mrf.mxu1 }
 0x23d   : > { %2874 = vst.msk [vmem:[%s4137_s9 + $0x180] sm:$0xff] %vm592_vm1, %v2407_v16 }
 0x23e   : > { %v3243_v34 = vpop.f32.mrf.mxu1 }
 0x23f   : > { %2877 = vst.msk [vmem:[%s4137_s9 + $0x198] sm:$0xff] %vm592_vm1, %v3243_v34 }
 0x240   : > { %v2417_v23 = vpop.f32.mrf.mxu1 }
 0x241   : > { %2876 = vst.msk [vmem:[%s4137_s9 + $0x190] sm:$0xff] %vm592_vm1, %v2417_v23 }
 0x242   : > { %v3246_v33 = vpop.f32.mrf.mxu1 }
 0x243   : > { %2879 = vst.msk [vmem:[%s4137_s9 + $0x1a8] sm:$0xff] %vm592_vm1, %v3246_v33 }
 0x244   : > { %v2427_v30 = vpop.f32.mrf.mxu1 }
 0x245   : > { %2878 = vst.msk [vmem:[%s4137_s9 + $0x1a0] sm:$0xff] %vm592_vm1, %v2427_v30 }
 0x246   : > { %v3249_v35 = vpop.f32.mrf.mxu1 }
 0x247   : > { %2881 = vst.msk [vmem:[%s4137_s9 + $0x1b8] sm:$0xff] %vm592_vm1, %v3249_v35 }
 0x248   : > { %v2437_v7 = vpop.f32.mrf.mxu1 }
 0x249   : > { %2880 = vst.msk [vmem:[%s4137_s9 + $0x1b0] sm:$0xff] %vm592_vm1, %v2437_v7 }
 0x24a   : > { %3357 = shalt.err (!%p3354_p1)
}
 0x24b   : > { %s3358_s11 = scalar_lea.hbm %s4252_s23, 7168  ;;  %s3362_s15 = scalar_lea.hbm %s4307_s5, 14336 }
 0x24c   : > { %p3359_p2 = scmp.ne.s32.totalorder %s4252_s23, %s3358_s11  ;;  %p3363_p9 = scmp.lt.s32.totalorder %s4252_s23, %s4307_s5 }
 0x24d   : > { %p3364_p5 = scmp.lt.s32.totalorder %s3362_s15, %s3358_s11 }
 0x24e   : > { %p3360_p3 = pnand %p3359_p2, %p4320_p12 }
 0x24f   : > { %p3365_p6 = por %p3364_p5, %p3363_p9 }
 0x250   : > { %p3361_p4 = pneg %p3360_p3 }
 0x252   : > { %p3366_p10 = pnand %p3365_p6, %p3361_p4 }
 0x254   : > { %3369 = shalt.err (!%p3366_p10)
}
 0x255   : > { %s3417_s9 = smov 128   ;;  %s3418_s10 = smov 8  }
 0x256   : > { %3260 = dma.vmem_to_hbm [thread:$0]  (%p4320_p12), %s4254_s14, 7168, %s4252_s23, %s4262_s22, %s3417_s9, %s3417_s9, %s3418_s10  }
 0x257 PF: > { %p3277_p0 = scmp.ge.s32.totalorder %s3412_s21, 2  ;;  %s2484_s25 = sand.u32 1, %s3400_s18  }
 0x258   : > { %p4321_p7 = scmp.ne.s32.totalorder %s4312_s29, 0  ;;  %s2485_s26 = scalar_lea.sflag [#allocation3], %s2484_s25 }
 0x25a   : > { %p3270_p8 = pnand %p3277_p0, %p4321_p7 }
 0x25c   : > { %p3271_p11 = pneg %p3270_p8 }
 0x25e   : > { %3395 = dma.done.wait (%p3271_p11), %s2485_s26, 7168  }
 0x25f   : > { %3397 = vsyncadd (%p3271_p11), %s2485_s26, 4294960128  ;;  %p17_p13 = scmp.ge.s32.totalorder %s3474_s24, 4   ;;  %s4322_s18 = smov %s3404_s19 }
 0x260   : > { %s4323_s19 = smov %s3408_s20  ;;  %s4324_s20 = smov %s3485_s27 }
 0x261   : > { %s4325_s21 = smov %s3474_s24  ;;  %19 = sbr.rel (!%p17_p13) target bundleno = 5 (0x5), region = 97 }
 0x266   :  { %2490 = vsyncpa [#allocation3], 1 }
 0x267   :  { %2492 = vsyncpa [#allocation3 + $0x1], 1 }
 0x268   :  { %2493 = vsyncpa [#allocation4], 1 }
 0x269   :  { %2495 = vsyncpa [#allocation4 + $0x1], 1 }
 0x26a   :  { %2496 = vsyncpa [#allocation6], 1 }

</bundles_post_ra>
